<compile_context>
chip_gen: v5e
topology: v5e:2x2
jax: 0.10.0
libtpu: 0.0.40
codegen_flags: <defaults>
</compile_context>

<pallas_src>
import functools

import numpy as np
import jax
import jax.numpy as jnp
from jax.experimental import pallas as pl
from jax.experimental.pallas import tpu as pltpu


def _vmem():
    return pl.BlockSpec(memory_space=pltpu.MemorySpace.VMEM)


# ------------------------------ Pallas kernel -------------------------------

def actor_kernel(p1_ref, w1_ref, b1_ref, sel_ref, w2_ref, b2_ref,
                 sg_ref, hw3_ref, hb_ref, g_ref, beta_ref,
                 tw1f_ref, tw1s_ref, tb1_ref, tw2_ref, tb2_ref,
                 w3mu_ref, b3mu_ref, w3ls_ref, b3ls_ref,
                 mu_ref, std_ref, a2_scr,
                 *, num_taps, n_sp, batch, log_std_min, log_std_max):
    # conv1 as im2col matmul (+bias, ReLU); /255 already folded into w1.
    a1 = jnp.dot(p1_ref[...], w1_ref[...], preferred_element_type=jnp.float32)
    a1 = jnp.maximum(a1 + b1_ref[...], 0.0)                 # [rows1, 32]

    # conv2 as 9-tap accumulation: per tap, a 0/1 selection matmul gathers the
    # needed conv1 rows, then the channel contraction runs on the MXU.
    acc = jnp.zeros(a2_scr.shape, jnp.float32)
    for t in range(num_taps):                               # static unroll (9)
        gath = jnp.dot(sel_ref[t], a1, preferred_element_type=jnp.float32)
        acc = acc + jnp.dot(gath, w2_ref[t], preferred_element_type=jnp.float32)
    # rows are (spatial-major, batch-minor): row = sp * batch + b
    a2_scr[...] = jnp.maximum(acc + b2_ref[...], 0.0)       # [n_sp*B, 32]

    # encoder head Linear over the flattened conv2 activation.  The PyTorch
    # flatten is realized as a sum of per-spatial [B,32]x[32,F] dots against a
    # pre-regrouped head weight — no in-kernel reshape / relayout needed.
    z = jnp.zeros((batch, hb_ref.shape[-1]), jnp.float32)
    for sp in range(n_sp):                                  # static unroll (25)
        blk = a2_scr[pl.ds(sp * batch, batch), :]           # [B, 32]
        z = z + jnp.dot(blk, hw3_ref[sp], preferred_element_type=jnp.float32)
    z = z + hb_ref[...]

    # LayerNorm -> tanh
    mean = jnp.mean(z, axis=-1, keepdims=True)
    var = jnp.mean((z - mean) ** 2, axis=-1, keepdims=True)
    feat = jnp.tanh((z - mean) * jax.lax.rsqrt(var + 1e-5) * g_ref[...]
                    + beta_ref[...])

    # trunk MLP; the feat/state_goals concat is replaced by a split first layer
    t1 = jnp.dot(feat, tw1f_ref[...], preferred_element_type=jnp.float32)
    t1 = t1 + jnp.dot(sg_ref[...], tw1s_ref[...], preferred_element_type=jnp.float32)
    t1 = jnp.maximum(t1 + tb1_ref[...], 0.0)
    t2 = jnp.dot(t1, tw2_ref[...], preferred_element_type=jnp.float32)
    t2 = jnp.maximum(t2 + tb2_ref[...], 0.0)

    # chunk(2, dim=-1) realized as two matmuls on pre-split w3 columns
    mu = jnp.dot(t2, w3mu_ref[...], preferred_element_type=jnp.float32) + b3mu_ref[...]
    ls = jnp.dot(t2, w3ls_ref[...], preferred_element_type=jnp.float32) + b3ls_ref[...]
    ls = jnp.tanh(ls)
    ls = log_std_min + 0.5 * (log_std_max - log_std_min) * (ls + 1.0)
    mu_ref[...] = mu
    std_ref[...] = jnp.exp(ls)


# ------------------------------ kernel wrapper -------------------------------

def actor_pallas(patches1, sg, kp, *, batch, log_std_bounds):
    rows2 = kp["sel"].shape[1]
    n_sp = kp["hw3"].shape[0]
    action_dim = kp["w3_mu"].shape[1]
    kern = functools.partial(
        actor_kernel,
        num_taps=kp["sel"].shape[0], n_sp=n_sp, batch=batch,
        log_std_min=float(log_std_bounds[0]),
        log_std_max=float(log_std_bounds[1]))
    return pl.pallas_call(
        kern,
        out_shape=(jax.ShapeDtypeStruct((batch, action_dim), jnp.float32),
                   jax.ShapeDtypeStruct((batch, action_dim), jnp.float32)),
        in_specs=[_vmem() for _ in range(20)],
        out_specs=(_vmem(), _vmem()),
        scratch_shapes=[pltpu.VMEM((rows2, 32), jnp.float32)],
    )(patches1, kp["w1mat"], kp["b1"], kp["sel"], kp["w2taps"], kp["b2"],
      sg, kp["hw3"], kp["head_b"], kp["ln_g"], kp["ln_b"],
      kp["w1_feat"], kp["w1_sg"], kp["t_b1"], kp["t_w2"], kp["t_b2"],
      kp["w3_mu"], kp["b3_mu"], kp["w3_ls"], kp["b3_ls"])


# ------------------------------- Glue (JAX) ----------------------------------

def im2col(x, ksize, stride):
    """x: [B, C, H, W].  Patches [B*OH*OW, C*k*k], K ordered (C, kh, kw)."""
    b, c, h, w = x.shape
    oh = (h - ksize) // stride + 1
    ow = (w - ksize) // stride + 1
    pats = []
    for i in range(ksize):
        for j in range(ksize):
            pats.append(x[:, :, i:i + stride * oh:stride, j:j + stride * ow:stride])
    p = jnp.stack(pats, axis=2)                      # [B, C, k*k, OH, OW]
    p = p.reshape(b, c * ksize * ksize, oh, ow)      # (C, kh, kw) ordering
    p = p.transpose(0, 2, 3, 1).reshape(b * oh * ow, c * ksize * ksize)
    return p, oh, ow


def build_conv2_selection(batch, oh1, ow1, ksize):
    """0/1 row-selection matrices S[t] (t = kh*ksize+kw): (S[t] @ a1)[r2, :] is
    the conv1 row feeding conv2 output r2 at tap t.  Output rows are ordered
    (spatial-major, batch-minor): r2 = (y*OW2 + x)*batch + b, so the encoder
    head can consume contiguous per-spatial [batch, 32] blocks."""
    oh2 = oh1 - ksize + 1
    ow2 = ow1 - ksize + 1
    sel = np.zeros((ksize * ksize, batch * oh2 * ow2, batch * oh1 * ow1),
                   np.float32)
    for i in range(ksize):
        for j in range(ksize):
            t = i * ksize + j
            for b in range(batch):
                for y in range(oh2):
                    for x in range(ow2):
                        r2 = (y * ow2 + x) * batch + b
                        r1 = b * oh1 * ow1 + (y + i) * ow1 + (x + j)
                        sel[t, r2, r1] = 1.0
    return jnp.asarray(sel), oh2, ow2


def init_params(key, obs_shape, feature_dim, lstate_shape, hidden_dim, action_dim):
    """Parameters in the natural PyTorch layout."""
    ks = jax.random.split(key, 6)
    c_in = obs_shape[0]

    def nrm(k, shape, scale=0.1):
        return (scale * jax.random.normal(k, shape)).astype(jnp.float32)

    h1 = (obs_shape[1] - 3) // 2 + 1
    h2 = h1 - 2
    flat = 32 * h2 * h2
    return dict(
        conv1_w=nrm(ks[0], (32, c_in, 3, 3)),
        conv1_b=jnp.zeros((32,), jnp.float32),
        conv2_w=nrm(ks[1], (32, 32, 3, 3)),
        conv2_b=jnp.zeros((32,), jnp.float32),
        head_w=nrm(ks[2], (flat, feature_dim), 0.02),
        head_b=jnp.zeros((feature_dim,), jnp.float32),
        ln_g=jnp.ones((feature_dim,), jnp.float32),
        ln_b=jnp.zeros((feature_dim,), jnp.float32),
        t_w1=nrm(ks[3], (feature_dim + lstate_shape, hidden_dim)),
        t_b1=jnp.zeros((hidden_dim,), jnp.float32),
        t_w2=nrm(ks[4], (hidden_dim, hidden_dim)),
        t_b2=jnp.zeros((hidden_dim,), jnp.float32),
        t_w3=nrm(ks[5], (hidden_dim, 2 * action_dim)),
        t_b3=jnp.zeros((2 * action_dim,), jnp.float32),
    )


def prepare_params(params, obs_shape, feature_dim, action_dim, batch):
    """One-time conversion of PyTorch-layout params into kernel-ready layout."""
    c_in, hh, ww = obs_shape
    k = 3
    oh1 = (hh - k) // 2 + 1
    ow1 = (ww - k) // 2 + 1
    sel, oh2, ow2 = build_conv2_selection(batch, oh1, ow1, k)
    n_sp = oh2 * ow2

    # conv1: [Cout, Cin, k, k] -> [Cin*k*k, Cout], /255 normalization folded in
    w1mat = (params["conv1_w"].reshape(32, c_in * k * k).T / 255.0).astype(jnp.float32)
    # conv2: per-tap [Cin, Cout] matrices, tap index = kh*k + kw
    w2taps = params["conv2_w"].transpose(2, 3, 1, 0).reshape(k * k, 32, 32)
    # head: PyTorch flatten index is c*n_sp + sp; regroup to [n_sp, 32, F] so
    # the kernel contracts per-spatial [B,32] blocks against hw3[sp].
    hw3 = params["head_w"].reshape(32, n_sp, feature_dim).transpose(1, 0, 2)
    t_w1, t_w3, t_b3 = params["t_w1"], params["t_w3"], params["t_b3"]
    return dict(
        w1mat=w1mat, b1=params["conv1_b"].reshape(1, 32),
        sel=sel, w2taps=w2taps, b2=params["conv2_b"].reshape(1, 32),
        hw3=hw3, head_b=params["head_b"].reshape(1, feature_dim),
        ln_g=params["ln_g"].reshape(1, feature_dim),
        ln_b=params["ln_b"].reshape(1, feature_dim),
        w1_feat=t_w1[:feature_dim], w1_sg=t_w1[feature_dim:],
        t_b1=params["t_b1"].reshape(1, -1),
        t_w2=params["t_w2"], t_b2=params["t_b2"].reshape(1, -1),
        w3_mu=t_w3[:, :action_dim], b3_mu=t_b3[:action_dim].reshape(1, -1),
        w3_ls=t_w3[:, action_dim:], b3_ls=t_b3[action_dim:].reshape(1, -1),
    )


@functools.partial(jax.jit, static_argnames=("log_std_bounds",))
def actor_forward(kparams, obs, state_goals, log_std_bounds):
    bsz = obs.shape[0]
    # conv1 im2col on raw pixels (/255 is folded into w1mat); under jit these
    # slices/transposes fuse into one cheap XLA op feeding the kernel.
    patches1, _, _ = im2col(obs.astype(jnp.float32), 3, 2)
    sg = state_goals
    if sg.ndim > 2:
        sg = jnp.squeeze(sg, 1)
    mu, std = actor_pallas(patches1, sg.astype(jnp.float32), kparams,
                           batch=bsz, log_std_bounds=log_std_bounds)
    # TODO(synk): SquashedNormal distribution object (sampling/log_prob) has no
    # Pallas equivalent; the kernel returns its parameters (mu, std).
    return mu, std


# ------------------------ pure-JAX reference (check) -------------------------

def reference_forward(params, obs, state_goals, log_std_bounds):
    hp = jax.lax.Precision.HIGHEST

    def conv(x, w, b, stride):
        y = jax.lax.conv_general_dilated(
            x, w, (stride, stride), "VALID",
            dimension_numbers=("NCHW", "OIHW", "NCHW"), precision=hp)
        return jax.nn.relu(y + b.reshape(1, -1, 1, 1))

    x = obs.astype(jnp.float32) / 255.0
    h = conv(x, params["conv1_w"], params["conv1_b"], 2)
    h = conv(h, params["conv2_w"], params["conv2_b"], 1)
    flat = h.reshape(h.shape[0], -1)
    z = jnp.dot(flat, params["head_w"], precision=hp) + params["head_b"]
    mean = z.mean(-1, keepdims=True)
    var = ((z - mean) ** 2).mean(-1, keepdims=True)
    feat = jnp.tanh((z - mean) / jnp.sqrt(var + 1e-5) * params["ln_g"] + params["ln_b"])
    sg = state_goals
    if sg.ndim > feat.ndim:
        sg = jnp.squeeze(sg, 1)
    t = jnp.concatenate([feat, sg.astype(jnp.float32)], axis=-1)
    t = jax.nn.relu(jnp.dot(t, params["t_w1"], precision=hp) + params["t_b1"])
    t = jax.nn.relu(jnp.dot(t, params["t_w2"], precision=hp) + params["t_b2"])
    out = jnp.dot(t, params["t_w3"], precision=hp) + params["t_b3"]
    a = out.shape[-1] // 2
    mu, log_std = out[:, :a], out[:, a:]
    lo, hi = log_std_bounds
    log_std = lo + 0.5 * (hi - lo) * (jnp.tanh(log_std) + 1.0)
    return mu, jnp.exp(log_std)


if __name__ == "__main__":
    key = jax.random.PRNGKey(0)
    k_obs, k_goal, k_par = jax.random.split(key, 3)

    # small shapes consistent with the module
    B, C, H, W = 2, 4, 16, 16
    feature_dim = 32
    lstate_shape = 8
    hidden_dim = 32
    action_dim = 4
    log_std_bounds = (-10.0, 2.0)

    obs = jax.random.uniform(k_obs, (B, C, H, W), jnp.float32, 0.0, 255.0)
    state_goals = jax.random.normal(k_goal, (B, 1, lstate_shape), jnp.float32)

    params = init_params(k_par, (C, H, W), feature_dim, lstate_shape,
                         hidden_dim, action_dim)
    kparams = prepare_params(params, (C, H, W), feature_dim, action_dim, batch=B)

    mu, std = actor_forward(kparams, obs, state_goals, log_std_bounds)
    jax.block_until_ready((mu, std))

    assert mu.shape == (B, action_dim) and std.shape == (B, action_dim)
    assert bool(jnp.all(std > 0.0)) and bool(jnp.all(jnp.isfinite(mu)))

    mu_ref, std_ref = reference_forward(params, obs, state_goals, log_std_bounds)
    assert bool(jnp.allclose(mu, mu_ref, rtol=5e-2, atol=5e-3)), "mu mismatch"
    assert bool(jnp.allclose(std, std_ref, rtol=5e-2, atol=1e-3)), "std mismatch"

    print("KERNEL_OK")
</pallas_src>

<mosaic_0001>
module attributes {stable_mosaic.version = 11 : i64} {
  func.func @actor_kernel(%arg0: memref<98x36xf32, #tpu.memory_space<vmem>>, %arg1: memref<36x32xf32, #tpu.memory_space<vmem>>, %arg2: memref<1x32xf32, #tpu.memory_space<vmem>>, %arg3: memref<9x50x98xf32, #tpu.memory_space<vmem>>, %arg4: memref<9x32x32xf32, #tpu.memory_space<vmem>>, %arg5: memref<1x32xf32, #tpu.memory_space<vmem>>, %arg6: memref<2x8xf32, #tpu.memory_space<vmem>>, %arg7: memref<25x32x32xf32, #tpu.memory_space<vmem>>, %arg8: memref<1x32xf32, #tpu.memory_space<vmem>>, %arg9: memref<1x32xf32, #tpu.memory_space<vmem>>, %arg10: memref<1x32xf32, #tpu.memory_space<vmem>>, %arg11: memref<32x32xf32, #tpu.memory_space<vmem>>, %arg12: memref<8x32xf32, #tpu.memory_space<vmem>>, %arg13: memref<1x32xf32, #tpu.memory_space<vmem>>, %arg14: memref<32x32xf32, #tpu.memory_space<vmem>>, %arg15: memref<1x32xf32, #tpu.memory_space<vmem>>, %arg16: memref<32x4xf32, #tpu.memory_space<vmem>>, %arg17: memref<1x4xf32, #tpu.memory_space<vmem>>, %arg18: memref<32x4xf32, #tpu.memory_space<vmem>>, %arg19: memref<1x4xf32, #tpu.memory_space<vmem>>, %arg20: memref<2x4xf32, #tpu.memory_space<vmem>>, %arg21: memref<2x4xf32, #tpu.memory_space<vmem>>, %arg22: memref<50x32xf32, #tpu.memory_space<vmem>>) attributes {dimension_semantics = [], scalar_prefetch = 0 : i64, scratch_operands = 1 : i64, tpu.core_type = #tpu.core_type<tc>} {
    %c0 = arith.constant 0 : index
    %c0_0 = arith.constant 0 : index
    %0 = vector.load %arg0[%c0, %c0_0] : memref<98x36xf32, #tpu.memory_space<vmem>>, vector<98x36xf32>
    %c0_1 = arith.constant 0 : index
    %c0_2 = arith.constant 0 : index
    %1 = vector.load %arg1[%c0_1, %c0_2] : memref<36x32xf32, #tpu.memory_space<vmem>>, vector<36x32xf32>
    %cst = arith.constant dense<0.000000e+00> : vector<98x32xf32>
    %2 = tpu.matmul %0, %1, %cst {dimension_numbers = #tpu.dot_dimension_numbers<[1], [0], [0], [1], [0, 0, 1, 1], [], []>} : vector<98x36xf32>, vector<36x32xf32>, vector<98x32xf32> -> vector<98x32xf32>
    %c0_3 = arith.constant 0 : index
    %c0_4 = arith.constant 0 : index
    %3 = vector.load %arg2[%c0_3, %c0_4] : memref<1x32xf32, #tpu.memory_space<vmem>>, vector<1x32xf32>
    %4 = vector.broadcast %3 : vector<1x32xf32> to vector<98x32xf32>
    %5 = arith.addf %2, %4 : vector<98x32xf32>
    %cst_5 = arith.constant 0.000000e+00 : f32
    %6 = vector.broadcast %cst_5 : f32 to vector<98x32xf32>
    %7 = arith.maximumf %5, %6 : vector<98x32xf32>
    %cst_6 = arith.constant 0.000000e+00 : f32
    %8 = vector.broadcast %cst_6 : f32 to vector<50x32xf32>
    %c0_7 = arith.constant 0 : index
    %c0_8 = arith.constant 0 : index
    %c0_9 = arith.constant 0 : index
    %9 = vector.load %arg3[%c0_7, %c0_8, %c0_9] : memref<9x50x98xf32, #tpu.memory_space<vmem>>, vector<1x50x98xf32>
    %10 = vector.shape_cast %9 : vector<1x50x98xf32> to vector<50x98xf32>
    %cst_10 = arith.constant dense<0.000000e+00> : vector<50x32xf32>
    %11 = tpu.matmul %10, %7, %cst_10 {dimension_numbers = #tpu.dot_dimension_numbers<[1], [0], [0], [1], [0, 0, 1, 1], [], []>} : vector<50x98xf32>, vector<98x32xf32>, vector<50x32xf32> -> vector<50x32xf32>
    %c0_11 = arith.constant 0 : index
    %c0_12 = arith.constant 0 : index
    %c0_13 = arith.constant 0 : index
    %12 = vector.load %arg4[%c0_11, %c0_12, %c0_13] : memref<9x32x32xf32, #tpu.memory_space<vmem>>, vector<1x32x32xf32>
    %13 = vector.shape_cast %12 : vector<1x32x32xf32> to vector<32x32xf32>
    %cst_14 = arith.constant dense<0.000000e+00> : vector<50x32xf32>
    %14 = tpu.matmul %11, %13, %cst_14 {dimension_numbers = #tpu.dot_dimension_numbers<[1], [0], [0], [1], [0, 0, 1, 1], [], []>} : vector<50x32xf32>, vector<32x32xf32>, vector<50x32xf32> -> vector<50x32xf32>
    %15 = arith.addf %8, %14 : vector<50x32xf32>
    %c1 = arith.constant 1 : index
    %c0_15 = arith.constant 0 : index
    %c0_16 = arith.constant 0 : index
    %16 = vector.load %arg3[%c1, %c0_15, %c0_16] : memref<9x50x98xf32, #tpu.memory_space<vmem>>, vector<1x50x98xf32>
    %17 = vector.shape_cast %16 : vector<1x50x98xf32> to vector<50x98xf32>
    %cst_17 = arith.constant dense<0.000000e+00> : vector<50x32xf32>
    %18 = tpu.matmul %17, %7, %cst_17 {dimension_numbers = #tpu.dot_dimension_numbers<[1], [0], [0], [1], [0, 0, 1, 1], [], []>} : vector<50x98xf32>, vector<98x32xf32>, vector<50x32xf32> -> vector<50x32xf32>
    %c1_18 = arith.constant 1 : index
    %c0_19 = arith.constant 0 : index
    %c0_20 = arith.constant 0 : index
    %19 = vector.load %arg4[%c1_18, %c0_19, %c0_20] : memref<9x32x32xf32, #tpu.memory_space<vmem>>, vector<1x32x32xf32>
    %20 = vector.shape_cast %19 : vector<1x32x32xf32> to vector<32x32xf32>
    %cst_21 = arith.constant dense<0.000000e+00> : vector<50x32xf32>
    %21 = tpu.matmul %18, %20, %cst_21 {dimension_numbers = #tpu.dot_dimension_numbers<[1], [0], [0], [1], [0, 0, 1, 1], [], []>} : vector<50x32xf32>, vector<32x32xf32>, vector<50x32xf32> -> vector<50x32xf32>
    %22 = arith.addf %15, %21 : vector<50x32xf32>
    %c2 = arith.constant 2 : index
    %c0_22 = arith.constant 0 : index
    %c0_23 = arith.constant 0 : index
    %23 = vector.load %arg3[%c2, %c0_22, %c0_23] : memref<9x50x98xf32, #tpu.memory_space<vmem>>, vector<1x50x98xf32>
    %24 = vector.shape_cast %23 : vector<1x50x98xf32> to vector<50x98xf32>
    %cst_24 = arith.constant dense<0.000000e+00> : vector<50x32xf32>
    %25 = tpu.matmul %24, %7, %cst_24 {dimension_numbers = #tpu.dot_dimension_numbers<[1], [0], [0], [1], [0, 0, 1, 1], [], []>} : vector<50x98xf32>, vector<98x32xf32>, vector<50x32xf32> -> vector<50x32xf32>
    %c2_25 = arith.constant 2 : index
    %c0_26 = arith.constant 0 : index
    %c0_27 = arith.constant 0 : index
    %26 = vector.load %arg4[%c2_25, %c0_26, %c0_27] : memref<9x32x32xf32, #tpu.memory_space<vmem>>, vector<1x32x32xf32>
    %27 = vector.shape_cast %26 : vector<1x32x32xf32> to vector<32x32xf32>
    %cst_28 = arith.constant dense<0.000000e+00> : vector<50x32xf32>
    %28 = tpu.matmul %25, %27, %cst_28 {dimension_numbers = #tpu.dot_dimension_numbers<[1], [0], [0], [1], [0, 0, 1, 1], [], []>} : vector<50x32xf32>, vector<32x32xf32>, vector<50x32xf32> -> vector<50x32xf32>
    %29 = arith.addf %22, %28 : vector<50x32xf32>
    %c3 = arith.constant 3 : index
    %c0_29 = arith.constant 0 : index
    %c0_30 = arith.constant 0 : index
    %30 = vector.load %arg3[%c3, %c0_29, %c0_30] : memref<9x50x98xf32, #tpu.memory_space<vmem>>, vector<1x50x98xf32>
    %31 = vector.shape_cast %30 : vector<1x50x98xf32> to vector<50x98xf32>
    %cst_31 = arith.constant dense<0.000000e+00> : vector<50x32xf32>
    %32 = tpu.matmul %31, %7, %cst_31 {dimension_numbers = #tpu.dot_dimension_numbers<[1], [0], [0], [1], [0, 0, 1, 1], [], []>} : vector<50x98xf32>, vector<98x32xf32>, vector<50x32xf32> -> vector<50x32xf32>
    %c3_32 = arith.constant 3 : index
    %c0_33 = arith.constant 0 : index
    %c0_34 = arith.constant 0 : index
    %33 = vector.load %arg4[%c3_32, %c0_33, %c0_34] : memref<9x32x32xf32, #tpu.memory_space<vmem>>, vector<1x32x32xf32>
    %34 = vector.shape_cast %33 : vector<1x32x32xf32> to vector<32x32xf32>
    %cst_35 = arith.constant dense<0.000000e+00> : vector<50x32xf32>
    %35 = tpu.matmul %32, %34, %cst_35 {dimension_numbers = #tpu.dot_dimension_numbers<[1], [0], [0], [1], [0, 0, 1, 1], [], []>} : vector<50x32xf32>, vector<32x32xf32>, vector<50x32xf32> -> vector<50x32xf32>
    %36 = arith.addf %29, %35 : vector<50x32xf32>
    %c4 = arith.constant 4 : index
    %c0_36 = arith.constant 0 : index
    %c0_37 = arith.constant 0 : index
    %37 = vector.load %arg3[%c4, %c0_36, %c0_37] : memref<9x50x98xf32, #tpu.memory_space<vmem>>, vector<1x50x98xf32>
    %38 = vector.shape_cast %37 : vector<1x50x98xf32> to vector<50x98xf32>
    %cst_38 = arith.constant dense<0.000000e+00> : vector<50x32xf32>
    %39 = tpu.matmul %38, %7, %cst_38 {dimension_numbers = #tpu.dot_dimension_numbers<[1], [0], [0], [1], [0, 0, 1, 1], [], []>} : vector<50x98xf32>, vector<98x32xf32>, vector<50x32xf32> -> vector<50x32xf32>
    %c4_39 = arith.constant 4 : index
    %c0_40 = arith.constant 0 : index
    %c0_41 = arith.constant 0 : index
    %40 = vector.load %arg4[%c4_39, %c0_40, %c0_41] : memref<9x32x32xf32, #tpu.memory_space<vmem>>, vector<1x32x32xf32>
    %41 = vector.shape_cast %40 : vector<1x32x32xf32> to vector<32x32xf32>
    %cst_42 = arith.constant dense<0.000000e+00> : vector<50x32xf32>
    %42 = tpu.matmul %39, %41, %cst_42 {dimension_numbers = #tpu.dot_dimension_numbers<[1], [0], [0], [1], [0, 0, 1, 1], [], []>} : vector<50x32xf32>, vector<32x32xf32>, vector<50x32xf32> -> vector<50x32xf32>
    %43 = arith.addf %36, %42 : vector<50x32xf32>
    %c5 = arith.constant 5 : index
    %c0_43 = arith.constant 0 : index
    %c0_44 = arith.constant 0 : index
    %44 = vector.load %arg3[%c5, %c0_43, %c0_44] : memref<9x50x98xf32, #tpu.memory_space<vmem>>, vector<1x50x98xf32>
    %45 = vector.shape_cast %44 : vector<1x50x98xf32> to vector<50x98xf32>
    %cst_45 = arith.constant dense<0.000000e+00> : vector<50x32xf32>
    %46 = tpu.matmul %45, %7, %cst_45 {dimension_numbers = #tpu.dot_dimension_numbers<[1], [0], [0], [1], [0, 0, 1, 1], [], []>} : vector<50x98xf32>, vector<98x32xf32>, vector<50x32xf32> -> vector<50x32xf32>
    %c5_46 = arith.constant 5 : index
    %c0_47 = arith.constant 0 : index
    %c0_48 = arith.constant 0 : index
    %47 = vector.load %arg4[%c5_46, %c0_47, %c0_48] : memref<9x32x32xf32, #tpu.memory_space<vmem>>, vector<1x32x32xf32>
    %48 = vector.shape_cast %47 : vector<1x32x32xf32> to vector<32x32xf32>
    %cst_49 = arith.constant dense<0.000000e+00> : vector<50x32xf32>
    %49 = tpu.matmul %46, %48, %cst_49 {dimension_numbers = #tpu.dot_dimension_numbers<[1], [0], [0], [1], [0, 0, 1, 1], [], []>} : vector<50x32xf32>, vector<32x32xf32>, vector<50x32xf32> -> vector<50x32xf32>
    %50 = arith.addf %43, %49 : vector<50x32xf32>
    %c6 = arith.constant 6 : index
    %c0_50 = arith.constant 0 : index
    %c0_51 = arith.constant 0 : index
    %51 = vector.load %arg3[%c6, %c0_50, %c0_51] : memref<9x50x98xf32, #tpu.memory_space<vmem>>, vector<1x50x98xf32>
    %52 = vector.shape_cast %51 : vector<1x50x98xf32> to vector<50x98xf32>
    %cst_52 = arith.constant dense<0.000000e+00> : vector<50x32xf32>
    %53 = tpu.matmul %52, %7, %cst_52 {dimension_numbers = #tpu.dot_dimension_numbers<[1], [0], [0], [1], [0, 0, 1, 1], [], []>} : vector<50x98xf32>, vector<98x32xf32>, vector<50x32xf32> -> vector<50x32xf32>
    %c6_53 = arith.constant 6 : index
    %c0_54 = arith.constant 0 : index
    %c0_55 = arith.constant 0 : index
    %54 = vector.load %arg4[%c6_53, %c0_54, %c0_55] : memref<9x32x32xf32, #tpu.memory_space<vmem>>, vector<1x32x32xf32>
    %55 = vector.shape_cast %54 : vector<1x32x32xf32> to vector<32x32xf32>
    %cst_56 = arith.constant dense<0.000000e+00> : vector<50x32xf32>
    %56 = tpu.matmul %53, %55, %cst_56 {dimension_numbers = #tpu.dot_dimension_numbers<[1], [0], [0], [1], [0, 0, 1, 1], [], []>} : vector<50x32xf32>, vector<32x32xf32>, vector<50x32xf32> -> vector<50x32xf32>
    %57 = arith.addf %50, %56 : vector<50x32xf32>
    %c7 = arith.constant 7 : index
    %c0_57 = arith.constant 0 : index
    %c0_58 = arith.constant 0 : index
    %58 = vector.load %arg3[%c7, %c0_57, %c0_58] : memref<9x50x98xf32, #tpu.memory_space<vmem>>, vector<1x50x98xf32>
    %59 = vector.shape_cast %58 : vector<1x50x98xf32> to vector<50x98xf32>
    %cst_59 = arith.constant dense<0.000000e+00> : vector<50x32xf32>
    %60 = tpu.matmul %59, %7, %cst_59 {dimension_numbers = #tpu.dot_dimension_numbers<[1], [0], [0], [1], [0, 0, 1, 1], [], []>} : vector<50x98xf32>, vector<98x32xf32>, vector<50x32xf32> -> vector<50x32xf32>
    %c7_60 = arith.constant 7 : index
    %c0_61 = arith.constant 0 : index
    %c0_62 = arith.constant 0 : index
    %61 = vector.load %arg4[%c7_60, %c0_61, %c0_62] : memref<9x32x32xf32, #tpu.memory_space<vmem>>, vector<1x32x32xf32>
    %62 = vector.shape_cast %61 : vector<1x32x32xf32> to vector<32x32xf32>
    %cst_63 = arith.constant dense<0.000000e+00> : vector<50x32xf32>
    %63 = tpu.matmul %60, %62, %cst_63 {dimension_numbers = #tpu.dot_dimension_numbers<[1], [0], [0], [1], [0, 0, 1, 1], [], []>} : vector<50x32xf32>, vector<32x32xf32>, vector<50x32xf32> -> vector<50x32xf32>
    %64 = arith.addf %57, %63 : vector<50x32xf32>
    %c8 = arith.constant 8 : index
    %c0_64 = arith.constant 0 : index
    %c0_65 = arith.constant 0 : index
    %65 = vector.load %arg3[%c8, %c0_64, %c0_65] : memref<9x50x98xf32, #tpu.memory_space<vmem>>, vector<1x50x98xf32>
    %66 = vector.shape_cast %65 : vector<1x50x98xf32> to vector<50x98xf32>
    %cst_66 = arith.constant dense<0.000000e+00> : vector<50x32xf32>
    %67 = tpu.matmul %66, %7, %cst_66 {dimension_numbers = #tpu.dot_dimension_numbers<[1], [0], [0], [1], [0, 0, 1, 1], [], []>} : vector<50x98xf32>, vector<98x32xf32>, vector<50x32xf32> -> vector<50x32xf32>
    %c8_67 = arith.constant 8 : index
    %c0_68 = arith.constant 0 : index
    %c0_69 = arith.constant 0 : index
    %68 = vector.load %arg4[%c8_67, %c0_68, %c0_69] : memref<9x32x32xf32, #tpu.memory_space<vmem>>, vector<1x32x32xf32>
    %69 = vector.shape_cast %68 : vector<1x32x32xf32> to vector<32x32xf32>
    %cst_70 = arith.constant dense<0.000000e+00> : vector<50x32xf32>
    %70 = tpu.matmul %67, %69, %cst_70 {dimension_numbers = #tpu.dot_dimension_numbers<[1], [0], [0], [1], [0, 0, 1, 1], [], []>} : vector<50x32xf32>, vector<32x32xf32>, vector<50x32xf32> -> vector<50x32xf32>
    %71 = arith.addf %64, %70 : vector<50x32xf32>
    %c0_71 = arith.constant 0 : index
    %c0_72 = arith.constant 0 : index
    %72 = vector.load %arg5[%c0_71, %c0_72] : memref<1x32xf32, #tpu.memory_space<vmem>>, vector<1x32xf32>
    %73 = vector.broadcast %72 : vector<1x32xf32> to vector<50x32xf32>
    %74 = arith.addf %71, %73 : vector<50x32xf32>
    %cst_73 = arith.constant 0.000000e+00 : f32
    %75 = vector.broadcast %cst_73 : f32 to vector<50x32xf32>
    %76 = arith.maximumf %74, %75 : vector<50x32xf32>
    %c0_74 = arith.constant 0 : index
    %c0_75 = arith.constant 0 : index
    %77 = vector.load %arg22[%c0_74, %c0_75] : memref<50x32xf32, #tpu.memory_space<vmem>>, vector<50x32xf32>
    tpu.vector_store %arg22[%c0_74, %c0_75], %76 {strides = array<i32>} : memref<50x32xf32, #tpu.memory_space<vmem>>, vector<50x32xf32>,
    %cst_76 = arith.constant 0.000000e+00 : f32
    %78 = vector.broadcast %cst_76 : f32 to vector<2x32xf32>
    %c0_77 = arith.constant 0 : index
    %c0_78 = arith.constant 0 : index
    %79 = vector.load %arg22[%c0_77, %c0_78] : memref<50x32xf32, #tpu.memory_space<vmem>>, vector<2x32xf32>
    %c0_79 = arith.constant 0 : index
    %c0_80 = arith.constant 0 : index
    %c0_81 = arith.constant 0 : index
    %80 = vector.load %arg7[%c0_79, %c0_80, %c0_81] : memref<25x32x32xf32, #tpu.memory_space<vmem>>, vector<1x32x32xf32>
    %81 = vector.shape_cast %80 : vector<1x32x32xf32> to vector<32x32xf32>
    %cst_82 = arith.constant dense<0.000000e+00> : vector<2x32xf32>
    %82 = tpu.matmul %79, %81, %cst_82 {dimension_numbers = #tpu.dot_dimension_numbers<[1], [0], [0], [1], [0, 0, 1, 1], [], []>} : vector<2x32xf32>, vector<32x32xf32>, vector<2x32xf32> -> vector<2x32xf32>
    %83 = arith.addf %78, %82 : vector<2x32xf32>
    %c2_83 = arith.constant 2 : index
    %c0_84 = arith.constant 0 : index
    %84 = vector.load %arg22[%c2_83, %c0_84] : memref<50x32xf32, #tpu.memory_space<vmem>>, vector<2x32xf32>
    %c1_85 = arith.constant 1 : index
    %c0_86 = arith.constant 0 : index
    %c0_87 = arith.constant 0 : index
    %85 = vector.load %arg7[%c1_85, %c0_86, %c0_87] : memref<25x32x32xf32, #tpu.memory_space<vmem>>, vector<1x32x32xf32>
    %86 = vector.shape_cast %85 : vector<1x32x32xf32> to vector<32x32xf32>
    %cst_88 = arith.constant dense<0.000000e+00> : vector<2x32xf32>
    %87 = tpu.matmul %84, %86, %cst_88 {dimension_numbers = #tpu.dot_dimension_numbers<[1], [0], [0], [1], [0, 0, 1, 1], [], []>} : vector<2x32xf32>, vector<32x32xf32>, vector<2x32xf32> -> vector<2x32xf32>
    %88 = arith.addf %83, %87 : vector<2x32xf32>
    %c4_89 = arith.constant 4 : index
    %c0_90 = arith.constant 0 : index
    %89 = vector.load %arg22[%c4_89, %c0_90] : memref<50x32xf32, #tpu.memory_space<vmem>>, vector<2x32xf32>
    %c2_91 = arith.constant 2 : index
    %c0_92 = arith.constant 0 : index
    %c0_93 = arith.constant 0 : index
    %90 = vector.load %arg7[%c2_91, %c0_92, %c0_93] : memref<25x32x32xf32, #tpu.memory_space<vmem>>, vector<1x32x32xf32>
    %91 = vector.shape_cast %90 : vector<1x32x32xf32> to vector<32x32xf32>
    %cst_94 = arith.constant dense<0.000000e+00> : vector<2x32xf32>
    %92 = tpu.matmul %89, %91, %cst_94 {dimension_numbers = #tpu.dot_dimension_numbers<[1], [0], [0], [1], [0, 0, 1, 1], [], []>} : vector<2x32xf32>, vector<32x32xf32>, vector<2x32xf32> -> vector<2x32xf32>
    %93 = arith.addf %88, %92 : vector<2x32xf32>
    %c6_95 = arith.constant 6 : index
    %c0_96 = arith.constant 0 : index
    %94 = vector.load %arg22[%c6_95, %c0_96] : memref<50x32xf32, #tpu.memory_space<vmem>>, vector<2x32xf32>
    %c3_97 = arith.constant 3 : index
    %c0_98 = arith.constant 0 : index
    %c0_99 = arith.constant 0 : index
    %95 = vector.load %arg7[%c3_97, %c0_98, %c0_99] : memref<25x32x32xf32, #tpu.memory_space<vmem>>, vector<1x32x32xf32>
    %96 = vector.shape_cast %95 : vector<1x32x32xf32> to vector<32x32xf32>
    %cst_100 = arith.constant dense<0.000000e+00> : vector<2x32xf32>
    %97 = tpu.matmul %94, %96, %cst_100 {dimension_numbers = #tpu.dot_dimension_numbers<[1], [0], [0], [1], [0, 0, 1, 1], [], []>} : vector<2x32xf32>, vector<32x32xf32>, vector<2x32xf32> -> vector<2x32xf32>
    %98 = arith.addf %93, %97 : vector<2x32xf32>
    %c8_101 = arith.constant 8 : index
    %c0_102 = arith.constant 0 : index
    %99 = vector.load %arg22[%c8_101, %c0_102] : memref<50x32xf32, #tpu.memory_space<vmem>>, vector<2x32xf32>
    %c4_103 = arith.constant 4 : index
    %c0_104 = arith.constant 0 : index
    %c0_105 = arith.constant 0 : index
    %100 = vector.load %arg7[%c4_103, %c0_104, %c0_105] : memref<25x32x32xf32, #tpu.memory_space<vmem>>, vector<1x32x32xf32>
    %101 = vector.shape_cast %100 : vector<1x32x32xf32> to vector<32x32xf32>
    %cst_106 = arith.constant dense<0.000000e+00> : vector<2x32xf32>
    %102 = tpu.matmul %99, %101, %cst_106 {dimension_numbers = #tpu.dot_dimension_numbers<[1], [0], [0], [1], [0, 0, 1, 1], [], []>} : vector<2x32xf32>, vector<32x32xf32>, vector<2x32xf32> -> vector<2x32xf32>
    %103 = arith.addf %98, %102 : vector<2x32xf32>
    %c10 = arith.constant 10 : index
    %c0_107 = arith.constant 0 : index
    %104 = vector.load %arg22[%c10, %c0_107] : memref<50x32xf32, #tpu.memory_space<vmem>>, vector<2x32xf32>
    %c5_108 = arith.constant 5 : index
    %c0_109 = arith.constant 0 : index
    %c0_110 = arith.constant 0 : index
    %105 = vector.load %arg7[%c5_108, %c0_109, %c0_110] : memref<25x32x32xf32, #tpu.memory_space<vmem>>, vector<1x32x32xf32>
    %106 = vector.shape_cast %105 : vector<1x32x32xf32> to vector<32x32xf32>
    %cst_111 = arith.constant dense<0.000000e+00> : vector<2x32xf32>
    %107 = tpu.matmul %104, %106, %cst_111 {dimension_numbers = #tpu.dot_dimension_numbers<[1], [0], [0], [1], [0, 0, 1, 1], [], []>} : vector<2x32xf32>, vector<32x32xf32>, vector<2x32xf32> -> vector<2x32xf32>
    %108 = arith.addf %103, %107 : vector<2x32xf32>
    %c12 = arith.constant 12 : index
    %c0_112 = arith.constant 0 : index
    %109 = vector.load %arg22[%c12, %c0_112] : memref<50x32xf32, #tpu.memory_space<vmem>>, vector<2x32xf32>
    %c6_113 = arith.constant 6 : index
    %c0_114 = arith.constant 0 : index
    %c0_115 = arith.constant 0 : index
    %110 = vector.load %arg7[%c6_113, %c0_114, %c0_115] : memref<25x32x32xf32, #tpu.memory_space<vmem>>, vector<1x32x32xf32>
    %111 = vector.shape_cast %110 : vector<1x32x32xf32> to vector<32x32xf32>
    %cst_116 = arith.constant dense<0.000000e+00> : vector<2x32xf32>
    %112 = tpu.matmul %109, %111, %cst_116 {dimension_numbers = #tpu.dot_dimension_numbers<[1], [0], [0], [1], [0, 0, 1, 1], [], []>} : vector<2x32xf32>, vector<32x32xf32>, vector<2x32xf32> -> vector<2x32xf32>
    %113 = arith.addf %108, %112 : vector<2x32xf32>
    %c14 = arith.constant 14 : index
    %c0_117 = arith.constant 0 : index
    %114 = vector.load %arg22[%c14, %c0_117] : memref<50x32xf32, #tpu.memory_space<vmem>>, vector<2x32xf32>
    %c7_118 = arith.constant 7 : index
    %c0_119 = arith.constant 0 : index
    %c0_120 = arith.constant 0 : index
    %115 = vector.load %arg7[%c7_118, %c0_119, %c0_120] : memref<25x32x32xf32, #tpu.memory_space<vmem>>, vector<1x32x32xf32>
    %116 = vector.shape_cast %115 : vector<1x32x32xf32> to vector<32x32xf32>
    %cst_121 = arith.constant dense<0.000000e+00> : vector<2x32xf32>
    %117 = tpu.matmul %114, %116, %cst_121 {dimension_numbers = #tpu.dot_dimension_numbers<[1], [0], [0], [1], [0, 0, 1, 1], [], []>} : vector<2x32xf32>, vector<32x32xf32>, vector<2x32xf32> -> vector<2x32xf32>
    %118 = arith.addf %113, %117 : vector<2x32xf32>
    %c16 = arith.constant 16 : index
    %c0_122 = arith.constant 0 : index
    %119 = vector.load %arg22[%c16, %c0_122] : memref<50x32xf32, #tpu.memory_space<vmem>>, vector<2x32xf32>
    %c8_123 = arith.constant 8 : index
    %c0_124 = arith.constant 0 : index
    %c0_125 = arith.constant 0 : index
    %120 = vector.load %arg7[%c8_123, %c0_124, %c0_125] : memref<25x32x32xf32, #tpu.memory_space<vmem>>, vector<1x32x32xf32>
    %121 = vector.shape_cast %120 : vector<1x32x32xf32> to vector<32x32xf32>
    %cst_126 = arith.constant dense<0.000000e+00> : vector<2x32xf32>
    %122 = tpu.matmul %119, %121, %cst_126 {dimension_numbers = #tpu.dot_dimension_numbers<[1], [0], [0], [1], [0, 0, 1, 1], [], []>} : vector<2x32xf32>, vector<32x32xf32>, vector<2x32xf32> -> vector<2x32xf32>
    %123 = arith.addf %118, %122 : vector<2x32xf32>
    %c18 = arith.constant 18 : index
    %c0_127 = arith.constant 0 : index
    %124 = vector.load %arg22[%c18, %c0_127] : memref<50x32xf32, #tpu.memory_space<vmem>>, vector<2x32xf32>
    %c9 = arith.constant 9 : index
    %c0_128 = arith.constant 0 : index
    %c0_129 = arith.constant 0 : index
    %125 = vector.load %arg7[%c9, %c0_128, %c0_129] : memref<25x32x32xf32, #tpu.memory_space<vmem>>, vector<1x32x32xf32>
    %126 = vector.shape_cast %125 : vector<1x32x32xf32> to vector<32x32xf32>
    %cst_130 = arith.constant dense<0.000000e+00> : vector<2x32xf32>
    %127 = tpu.matmul %124, %126, %cst_130 {dimension_numbers = #tpu.dot_dimension_numbers<[1], [0], [0], [1], [0, 0, 1, 1], [], []>} : vector<2x32xf32>, vector<32x32xf32>, vector<2x32xf32> -> vector<2x32xf32>
    %128 = arith.addf %123, %127 : vector<2x32xf32>
    %c20 = arith.constant 20 : index
    %c0_131 = arith.constant 0 : index
    %129 = vector.load %arg22[%c20, %c0_131] : memref<50x32xf32, #tpu.memory_space<vmem>>, vector<2x32xf32>
    %c10_132 = arith.constant 10 : index
    %c0_133 = arith.constant 0 : index
    %c0_134 = arith.constant 0 : index
    %130 = vector.load %arg7[%c10_132, %c0_133, %c0_134] : memref<25x32x32xf32, #tpu.memory_space<vmem>>, vector<1x32x32xf32>
    %131 = vector.shape_cast %130 : vector<1x32x32xf32> to vector<32x32xf32>
    %cst_135 = arith.constant dense<0.000000e+00> : vector<2x32xf32>
    %132 = tpu.matmul %129, %131, %cst_135 {dimension_numbers = #tpu.dot_dimension_numbers<[1], [0], [0], [1], [0, 0, 1, 1], [], []>} : vector<2x32xf32>, vector<32x32xf32>, vector<2x32xf32> -> vector<2x32xf32>
    %133 = arith.addf %128, %132 : vector<2x32xf32>
    %c22 = arith.constant 22 : index
    %c0_136 = arith.constant 0 : index
    %134 = vector.load %arg22[%c22, %c0_136] : memref<50x32xf32, #tpu.memory_space<vmem>>, vector<2x32xf32>
    %c11 = arith.constant 11 : index
    %c0_137 = arith.constant 0 : index
    %c0_138 = arith.constant 0 : index
    %135 = vector.load %arg7[%c11, %c0_137, %c0_138] : memref<25x32x32xf32, #tpu.memory_space<vmem>>, vector<1x32x32xf32>
    %136 = vector.shape_cast %135 : vector<1x32x32xf32> to vector<32x32xf32>
    %cst_139 = arith.constant dense<0.000000e+00> : vector<2x32xf32>
    %137 = tpu.matmul %134, %136, %cst_139 {dimension_numbers = #tpu.dot_dimension_numbers<[1], [0], [0], [1], [0, 0, 1, 1], [], []>} : vector<2x32xf32>, vector<32x32xf32>, vector<2x32xf32> -> vector<2x32xf32>
    %138 = arith.addf %133, %137 : vector<2x32xf32>
    %c24 = arith.constant 24 : index
    %c0_140 = arith.constant 0 : index
    %139 = vector.load %arg22[%c24, %c0_140] : memref<50x32xf32, #tpu.memory_space<vmem>>, vector<2x32xf32>
    %c12_141 = arith.constant 12 : index
    %c0_142 = arith.constant 0 : index
    %c0_143 = arith.constant 0 : index
    %140 = vector.load %arg7[%c12_141, %c0_142, %c0_143] : memref<25x32x32xf32, #tpu.memory_space<vmem>>, vector<1x32x32xf32>
    %141 = vector.shape_cast %140 : vector<1x32x32xf32> to vector<32x32xf32>
    %cst_144 = arith.constant dense<0.000000e+00> : vector<2x32xf32>
    %142 = tpu.matmul %139, %141, %cst_144 {dimension_numbers = #tpu.dot_dimension_numbers<[1], [0], [0], [1], [0, 0, 1, 1], [], []>} : vector<2x32xf32>, vector<32x32xf32>, vector<2x32xf32> -> vector<2x32xf32>
    %143 = arith.addf %138, %142 : vector<2x32xf32>
    %c26 = arith.constant 26 : index
    %c0_145 = arith.constant 0 : index
    %144 = vector.load %arg22[%c26, %c0_145] : memref<50x32xf32, #tpu.memory_space<vmem>>, vector<2x32xf32>
    %c13 = arith.constant 13 : index
    %c0_146 = arith.constant 0 : index
    %c0_147 = arith.constant 0 : index
    %145 = vector.load %arg7[%c13, %c0_146, %c0_147] : memref<25x32x32xf32, #tpu.memory_space<vmem>>, vector<1x32x32xf32>
    %146 = vector.shape_cast %145 : vector<1x32x32xf32> to vector<32x32xf32>
    %cst_148 = arith.constant dense<0.000000e+00> : vector<2x32xf32>
    %147 = tpu.matmul %144, %146, %cst_148 {dimension_numbers = #tpu.dot_dimension_numbers<[1], [0], [0], [1], [0, 0, 1, 1], [], []>} : vector<2x32xf32>, vector<32x32xf32>, vector<2x32xf32> -> vector<2x32xf32>
    %148 = arith.addf %143, %147 : vector<2x32xf32>
    %c28 = arith.constant 28 : index
    %c0_149 = arith.constant 0 : index
    %149 = vector.load %arg22[%c28, %c0_149] : memref<50x32xf32, #tpu.memory_space<vmem>>, vector<2x32xf32>
    %c14_150 = arith.constant 14 : index
    %c0_151 = arith.constant 0 : index
    %c0_152 = arith.constant 0 : index
    %150 = vector.load %arg7[%c14_150, %c0_151, %c0_152] : memref<25x32x32xf32, #tpu.memory_space<vmem>>, vector<1x32x32xf32>
    %151 = vector.shape_cast %150 : vector<1x32x32xf32> to vector<32x32xf32>
    %cst_153 = arith.constant dense<0.000000e+00> : vector<2x32xf32>
    %152 = tpu.matmul %149, %151, %cst_153 {dimension_numbers = #tpu.dot_dimension_numbers<[1], [0], [0], [1], [0, 0, 1, 1], [], []>} : vector<2x32xf32>, vector<32x32xf32>, vector<2x32xf32> -> vector<2x32xf32>
    %153 = arith.addf %148, %152 : vector<2x32xf32>
    %c30 = arith.constant 30 : index
    %c0_154 = arith.constant 0 : index
    %154 = vector.load %arg22[%c30, %c0_154] : memref<50x32xf32, #tpu.memory_space<vmem>>, vector<2x32xf32>
    %c15 = arith.constant 15 : index
    %c0_155 = arith.constant 0 : index
    %c0_156 = arith.constant 0 : index
    %155 = vector.load %arg7[%c15, %c0_155, %c0_156] : memref<25x32x32xf32, #tpu.memory_space<vmem>>, vector<1x32x32xf32>
    %156 = vector.shape_cast %155 : vector<1x32x32xf32> to vector<32x32xf32>
    %cst_157 = arith.constant dense<0.000000e+00> : vector<2x32xf32>
    %157 = tpu.matmul %154, %156, %cst_157 {dimension_numbers = #tpu.dot_dimension_numbers<[1], [0], [0], [1], [0, 0, 1, 1], [], []>} : vector<2x32xf32>, vector<32x32xf32>, vector<2x32xf32> -> vector<2x32xf32>
    %158 = arith.addf %153, %157 : vector<2x32xf32>
    %c32 = arith.constant 32 : index
    %c0_158 = arith.constant 0 : index
    %159 = vector.load %arg22[%c32, %c0_158] : memref<50x32xf32, #tpu.memory_space<vmem>>, vector<2x32xf32>
    %c16_159 = arith.constant 16 : index
    %c0_160 = arith.constant 0 : index
    %c0_161 = arith.constant 0 : index
    %160 = vector.load %arg7[%c16_159, %c0_160, %c0_161] : memref<25x32x32xf32, #tpu.memory_space<vmem>>, vector<1x32x32xf32>
    %161 = vector.shape_cast %160 : vector<1x32x32xf32> to vector<32x32xf32>
    %cst_162 = arith.constant dense<0.000000e+00> : vector<2x32xf32>
    %162 = tpu.matmul %159, %161, %cst_162 {dimension_numbers = #tpu.dot_dimension_numbers<[1], [0], [0], [1], [0, 0, 1, 1], [], []>} : vector<2x32xf32>, vector<32x32xf32>, vector<2x32xf32> -> vector<2x32xf32>
    %163 = arith.addf %158, %162 : vector<2x32xf32>
    %c34 = arith.constant 34 : index
    %c0_163 = arith.constant 0 : index
    %164 = vector.load %arg22[%c34, %c0_163] : memref<50x32xf32, #tpu.memory_space<vmem>>, vector<2x32xf32>
    %c17 = arith.constant 17 : index
    %c0_164 = arith.constant 0 : index
    %c0_165 = arith.constant 0 : index
    %165 = vector.load %arg7[%c17, %c0_164, %c0_165] : memref<25x32x32xf32, #tpu.memory_space<vmem>>, vector<1x32x32xf32>
    %166 = vector.shape_cast %165 : vector<1x32x32xf32> to vector<32x32xf32>
    %cst_166 = arith.constant dense<0.000000e+00> : vector<2x32xf32>
    %167 = tpu.matmul %164, %166, %cst_166 {dimension_numbers = #tpu.dot_dimension_numbers<[1], [0], [0], [1], [0, 0, 1, 1], [], []>} : vector<2x32xf32>, vector<32x32xf32>, vector<2x32xf32> -> vector<2x32xf32>
    %168 = arith.addf %163, %167 : vector<2x32xf32>
    %c36 = arith.constant 36 : index
    %c0_167 = arith.constant 0 : index
    %169 = vector.load %arg22[%c36, %c0_167] : memref<50x32xf32, #tpu.memory_space<vmem>>, vector<2x32xf32>
    %c18_168 = arith.constant 18 : index
    %c0_169 = arith.constant 0 : index
    %c0_170 = arith.constant 0 : index
    %170 = vector.load %arg7[%c18_168, %c0_169, %c0_170] : memref<25x32x32xf32, #tpu.memory_space<vmem>>, vector<1x32x32xf32>
    %171 = vector.shape_cast %170 : vector<1x32x32xf32> to vector<32x32xf32>
    %cst_171 = arith.constant dense<0.000000e+00> : vector<2x32xf32>
    %172 = tpu.matmul %169, %171, %cst_171 {dimension_numbers = #tpu.dot_dimension_numbers<[1], [0], [0], [1], [0, 0, 1, 1], [], []>} : vector<2x32xf32>, vector<32x32xf32>, vector<2x32xf32> -> vector<2x32xf32>
    %173 = arith.addf %168, %172 : vector<2x32xf32>
    %c38 = arith.constant 38 : index
    %c0_172 = arith.constant 0 : index
    %174 = vector.load %arg22[%c38, %c0_172] : memref<50x32xf32, #tpu.memory_space<vmem>>, vector<2x32xf32>
    %c19 = arith.constant 19 : index
    %c0_173 = arith.constant 0 : index
    %c0_174 = arith.constant 0 : index
    %175 = vector.load %arg7[%c19, %c0_173, %c0_174] : memref<25x32x32xf32, #tpu.memory_space<vmem>>, vector<1x32x32xf32>
    %176 = vector.shape_cast %175 : vector<1x32x32xf32> to vector<32x32xf32>
    %cst_175 = arith.constant dense<0.000000e+00> : vector<2x32xf32>
    %177 = tpu.matmul %174, %176, %cst_175 {dimension_numbers = #tpu.dot_dimension_numbers<[1], [0], [0], [1], [0, 0, 1, 1], [], []>} : vector<2x32xf32>, vector<32x32xf32>, vector<2x32xf32> -> vector<2x32xf32>
    %178 = arith.addf %173, %177 : vector<2x32xf32>
    %c40 = arith.constant 40 : index
    %c0_176 = arith.constant 0 : index
    %179 = vector.load %arg22[%c40, %c0_176] : memref<50x32xf32, #tpu.memory_space<vmem>>, vector<2x32xf32>
    %c20_177 = arith.constant 20 : index
    %c0_178 = arith.constant 0 : index
    %c0_179 = arith.constant 0 : index
    %180 = vector.load %arg7[%c20_177, %c0_178, %c0_179] : memref<25x32x32xf32, #tpu.memory_space<vmem>>, vector<1x32x32xf32>
    %181 = vector.shape_cast %180 : vector<1x32x32xf32> to vector<32x32xf32>
    %cst_180 = arith.constant dense<0.000000e+00> : vector<2x32xf32>
    %182 = tpu.matmul %179, %181, %cst_180 {dimension_numbers = #tpu.dot_dimension_numbers<[1], [0], [0], [1], [0, 0, 1, 1], [], []>} : vector<2x32xf32>, vector<32x32xf32>, vector<2x32xf32> -> vector<2x32xf32>
    %183 = arith.addf %178, %182 : vector<2x32xf32>
    %c42 = arith.constant 42 : index
    %c0_181 = arith.constant 0 : index
    %184 = vector.load %arg22[%c42, %c0_181] : memref<50x32xf32, #tpu.memory_space<vmem>>, vector<2x32xf32>
    %c21 = arith.constant 21 : index
    %c0_182 = arith.constant 0 : index
    %c0_183 = arith.constant 0 : index
    %185 = vector.load %arg7[%c21, %c0_182, %c0_183] : memref<25x32x32xf32, #tpu.memory_space<vmem>>, vector<1x32x32xf32>
    %186 = vector.shape_cast %185 : vector<1x32x32xf32> to vector<32x32xf32>
    %cst_184 = arith.constant dense<0.000000e+00> : vector<2x32xf32>
    %187 = tpu.matmul %184, %186, %cst_184 {dimension_numbers = #tpu.dot_dimension_numbers<[1], [0], [0], [1], [0, 0, 1, 1], [], []>} : vector<2x32xf32>, vector<32x32xf32>, vector<2x32xf32> -> vector<2x32xf32>
    %188 = arith.addf %183, %187 : vector<2x32xf32>
    %c44 = arith.constant 44 : index
    %c0_185 = arith.constant 0 : index
    %189 = vector.load %arg22[%c44, %c0_185] : memref<50x32xf32, #tpu.memory_space<vmem>>, vector<2x32xf32>
    %c22_186 = arith.constant 22 : index
    %c0_187 = arith.constant 0 : index
    %c0_188 = arith.constant 0 : index
    %190 = vector.load %arg7[%c22_186, %c0_187, %c0_188] : memref<25x32x32xf32, #tpu.memory_space<vmem>>, vector<1x32x32xf32>
    %191 = vector.shape_cast %190 : vector<1x32x32xf32> to vector<32x32xf32>
    %cst_189 = arith.constant dense<0.000000e+00> : vector<2x32xf32>
    %192 = tpu.matmul %189, %191, %cst_189 {dimension_numbers = #tpu.dot_dimension_numbers<[1], [0], [0], [1], [0, 0, 1, 1], [], []>} : vector<2x32xf32>, vector<32x32xf32>, vector<2x32xf32> -> vector<2x32xf32>
    %193 = arith.addf %188, %192 : vector<2x32xf32>
    %c46 = arith.constant 46 : index
    %c0_190 = arith.constant 0 : index
    %194 = vector.load %arg22[%c46, %c0_190] : memref<50x32xf32, #tpu.memory_space<vmem>>, vector<2x32xf32>
    %c23 = arith.constant 23 : index
    %c0_191 = arith.constant 0 : index
    %c0_192 = arith.constant 0 : index
    %195 = vector.load %arg7[%c23, %c0_191, %c0_192] : memref<25x32x32xf32, #tpu.memory_space<vmem>>, vector<1x32x32xf32>
    %196 = vector.shape_cast %195 : vector<1x32x32xf32> to vector<32x32xf32>
    %cst_193 = arith.constant dense<0.000000e+00> : vector<2x32xf32>
    %197 = tpu.matmul %194, %196, %cst_193 {dimension_numbers = #tpu.dot_dimension_numbers<[1], [0], [0], [1], [0, 0, 1, 1], [], []>} : vector<2x32xf32>, vector<32x32xf32>, vector<2x32xf32> -> vector<2x32xf32>
    %198 = arith.addf %193, %197 : vector<2x32xf32>
    %c48 = arith.constant 48 : index
    %c0_194 = arith.constant 0 : index
    %199 = vector.load %arg22[%c48, %c0_194] : memref<50x32xf32, #tpu.memory_space<vmem>>, vector<2x32xf32>
    %c24_195 = arith.constant 24 : index
    %c0_196 = arith.constant 0 : index
    %c0_197 = arith.constant 0 : index
    %200 = vector.load %arg7[%c24_195, %c0_196, %c0_197] : memref<25x32x32xf32, #tpu.memory_space<vmem>>, vector<1x32x32xf32>
    %201 = vector.shape_cast %200 : vector<1x32x32xf32> to vector<32x32xf32>
    %cst_198 = arith.constant dense<0.000000e+00> : vector<2x32xf32>
    %202 = tpu.matmul %199, %201, %cst_198 {dimension_numbers = #tpu.dot_dimension_numbers<[1], [0], [0], [1], [0, 0, 1, 1], [], []>} : vector<2x32xf32>, vector<32x32xf32>, vector<2x32xf32> -> vector<2x32xf32>
    %203 = arith.addf %198, %202 : vector<2x32xf32>
    %c0_199 = arith.constant 0 : index
    %c0_200 = arith.constant 0 : index
    %204 = vector.load %arg8[%c0_199, %c0_200] : memref<1x32xf32, #tpu.memory_space<vmem>>, vector<1x32xf32>
    %205 = vector.broadcast %204 : vector<1x32xf32> to vector<2x32xf32>
    %206 = arith.addf %203, %205 : vector<2x32xf32>
    %cst_201 = arith.constant dense<0.000000e+00> : vector<2xf32>
    %207 = vector.multi_reduction <add>, %206, %cst_201 [1] : vector<2x32xf32> to vector<2xf32>
    %208 = vector.shape_cast %207 : vector<2xf32> to vector<2x1xf32>
    %cst_202 = arith.constant 3.200000e+01 : f32
    %209 = vector.broadcast %cst_202 : f32 to vector<2x1xf32>
    %210 = arith.divf %208, %209 : vector<2x1xf32>
    %211 = vector.broadcast %210 : vector<2x1xf32> to vector<2x32xf32>
    %212 = arith.subf %206, %211 : vector<2x32xf32>
    %213 = arith.mulf %212, %212 : vector<2x32xf32>
    %cst_203 = arith.constant dense<0.000000e+00> : vector<2xf32>
    %214 = vector.multi_reduction <add>, %213, %cst_203 [1] : vector<2x32xf32> to vector<2xf32>
    %215 = vector.shape_cast %214 : vector<2xf32> to vector<2x1xf32>
    %cst_204 = arith.constant 3.200000e+01 : f32
    %216 = vector.broadcast %cst_204 : f32 to vector<2x1xf32>
    %217 = arith.divf %215, %216 : vector<2x1xf32>
    %218 = vector.broadcast %210 : vector<2x1xf32> to vector<2x32xf32>
    %219 = arith.subf %206, %218 : vector<2x32xf32>
    %cst_205 = arith.constant 9.99999974E-6 : f32
    %220 = vector.broadcast %cst_205 : f32 to vector<2x1xf32>
    %221 = arith.addf %217, %220 : vector<2x1xf32>
    %222 = math.rsqrt %221 : vector<2x1xf32>
    %223 = vector.broadcast %222 : vector<2x1xf32> to vector<2x32xf32>
    %224 = arith.mulf %219, %223 : vector<2x32xf32>
    %c0_206 = arith.constant 0 : index
    %c0_207 = arith.constant 0 : index
    %225 = vector.load %arg9[%c0_206, %c0_207] : memref<1x32xf32, #tpu.memory_space<vmem>>, vector<1x32xf32>
    %226 = vector.broadcast %225 : vector<1x32xf32> to vector<2x32xf32>
    %227 = arith.mulf %224, %226 : vector<2x32xf32>
    %c0_208 = arith.constant 0 : index
    %c0_209 = arith.constant 0 : index
    %228 = vector.load %arg10[%c0_208, %c0_209] : memref<1x32xf32, #tpu.memory_space<vmem>>, vector<1x32xf32>
    %229 = vector.broadcast %228 : vector<1x32xf32> to vector<2x32xf32>
    %230 = arith.addf %227, %229 : vector<2x32xf32>
    %231 = math.tanh %230 : vector<2x32xf32>
    %c0_210 = arith.constant 0 : index
    %c0_211 = arith.constant 0 : index
    %232 = vector.load %arg11[%c0_210, %c0_211] : memref<32x32xf32, #tpu.memory_space<vmem>>, vector<32x32xf32>
    %cst_212 = arith.constant dense<0.000000e+00> : vector<2x32xf32>
    %233 = tpu.matmul %231, %232, %cst_212 {dimension_numbers = #tpu.dot_dimension_numbers<[1], [0], [0], [1], [0, 0, 1, 1], [], []>} : vector<2x32xf32>, vector<32x32xf32>, vector<2x32xf32> -> vector<2x32xf32>
    %c0_213 = arith.constant 0 : index
    %c0_214 = arith.constant 0 : index
    %234 = vector.load %arg6[%c0_213, %c0_214] : memref<2x8xf32, #tpu.memory_space<vmem>>, vector<2x8xf32>
    %c0_215 = arith.constant 0 : index
    %c0_216 = arith.constant 0 : index
    %235 = vector.load %arg12[%c0_215, %c0_216] : memref<8x32xf32, #tpu.memory_space<vmem>>, vector<8x32xf32>
    %cst_217 = arith.constant dense<0.000000e+00> : vector<2x32xf32>
    %236 = tpu.matmul %234, %235, %cst_217 {dimension_numbers = #tpu.dot_dimension_numbers<[1], [0], [0], [1], [0, 0, 1, 1], [], []>} : vector<2x8xf32>, vector<8x32xf32>, vector<2x32xf32> -> vector<2x32xf32>
    %237 = arith.addf %233, %236 : vector<2x32xf32>
    %c0_218 = arith.constant 0 : index
    %c0_219 = arith.constant 0 : index
    %238 = vector.load %arg13[%c0_218, %c0_219] : memref<1x32xf32, #tpu.memory_space<vmem>>, vector<1x32xf32>
    %239 = vector.broadcast %238 : vector<1x32xf32> to vector<2x32xf32>
    %240 = arith.addf %237, %239 : vector<2x32xf32>
    %cst_220 = arith.constant 0.000000e+00 : f32
    %241 = vector.broadcast %cst_220 : f32 to vector<2x32xf32>
    %242 = arith.maximumf %240, %241 : vector<2x32xf32>
    %c0_221 = arith.constant 0 : index
    %c0_222 = arith.constant 0 : index
    %243 = vector.load %arg14[%c0_221, %c0_222] : memref<32x32xf32, #tpu.memory_space<vmem>>, vector<32x32xf32>
    %cst_223 = arith.constant dense<0.000000e+00> : vector<2x32xf32>
    %244 = tpu.matmul %242, %243, %cst_223 {dimension_numbers = #tpu.dot_dimension_numbers<[1], [0], [0], [1], [0, 0, 1, 1], [], []>} : vector<2x32xf32>, vector<32x32xf32>, vector<2x32xf32> -> vector<2x32xf32>
    %c0_224 = arith.constant 0 : index
    %c0_225 = arith.constant 0 : index
    %245 = vector.load %arg15[%c0_224, %c0_225] : memref<1x32xf32, #tpu.memory_space<vmem>>, vector<1x32xf32>
    %246 = vector.broadcast %245 : vector<1x32xf32> to vector<2x32xf32>
    %247 = arith.addf %244, %246 : vector<2x32xf32>
    %cst_226 = arith.constant 0.000000e+00 : f32
    %248 = vector.broadcast %cst_226 : f32 to vector<2x32xf32>
    %249 = arith.maximumf %247, %248 : vector<2x32xf32>
    %c0_227 = arith.constant 0 : index
    %c0_228 = arith.constant 0 : index
    %250 = vector.load %arg16[%c0_227, %c0_228] : memref<32x4xf32, #tpu.memory_space<vmem>>, vector<32x4xf32>
    %cst_229 = arith.constant dense<0.000000e+00> : vector<2x4xf32>
    %251 = tpu.matmul %249, %250, %cst_229 {dimension_numbers = #tpu.dot_dimension_numbers<[1], [0], [0], [1], [0, 0, 1, 1], [], []>} : vector<2x32xf32>, vector<32x4xf32>, vector<2x4xf32> -> vector<2x4xf32>
    %c0_230 = arith.constant 0 : index
    %c0_231 = arith.constant 0 : index
    %252 = vector.load %arg17[%c0_230, %c0_231] : memref<1x4xf32, #tpu.memory_space<vmem>>, vector<1x4xf32>
    %253 = vector.broadcast %252 : vector<1x4xf32> to vector<2x4xf32>
    %254 = arith.addf %251, %253 : vector<2x4xf32>
    %c0_232 = arith.constant 0 : index
    %c0_233 = arith.constant 0 : index
    %255 = vector.load %arg18[%c0_232, %c0_233] : memref<32x4xf32, #tpu.memory_space<vmem>>, vector<32x4xf32>
    %cst_234 = arith.constant dense<0.000000e+00> : vector<2x4xf32>
    %256 = tpu.matmul %249, %255, %cst_234 {dimension_numbers = #tpu.dot_dimension_numbers<[1], [0], [0], [1], [0, 0, 1, 1], [], []>} : vector<2x32xf32>, vector<32x4xf32>, vector<2x4xf32> -> vector<2x4xf32>
    %c0_235 = arith.constant 0 : index
    %c0_236 = arith.constant 0 : index
    %257 = vector.load %arg19[%c0_235, %c0_236] : memref<1x4xf32, #tpu.memory_space<vmem>>, vector<1x4xf32>
    %258 = vector.broadcast %257 : vector<1x4xf32> to vector<2x4xf32>
    %259 = arith.addf %256, %258 : vector<2x4xf32>
    %260 = math.tanh %259 : vector<2x4xf32>
    %cst_237 = arith.constant 1.000000e+00 : f32
    %261 = vector.broadcast %cst_237 : f32 to vector<2x4xf32>
    %262 = arith.addf %260, %261 : vector<2x4xf32>
    %cst_238 = arith.constant 6.000000e+00 : f32
    %263 = vector.broadcast %cst_238 : f32 to vector<2x4xf32>
    %264 = arith.mulf %263, %262 : vector<2x4xf32>
    %cst_239 = arith.constant -1.000000e+01 : f32
    %265 = vector.broadcast %cst_239 : f32 to vector<2x4xf32>
    %266 = arith.addf %265, %264 : vector<2x4xf32>
    %c0_240 = arith.constant 0 : index
    %c0_241 = arith.constant 0 : index
    %267 = vector.load %arg20[%c0_240, %c0_241] : memref<2x4xf32, #tpu.memory_space<vmem>>, vector<2x4xf32>
    tpu.vector_store %arg20[%c0_240, %c0_241], %254 {strides = array<i32>} : memref<2x4xf32, #tpu.memory_space<vmem>>, vector<2x4xf32>,
    %268 = math.exp %266 : vector<2x4xf32>
    %c0_242 = arith.constant 0 : index
    %c0_243 = arith.constant 0 : index
    %269 = vector.load %arg21[%c0_242, %c0_243] : memref<2x4xf32, #tpu.memory_space<vmem>>, vector<2x4xf32>
    tpu.vector_store %arg21[%c0_242, %c0_243], %268 {strides = array<i32>} : memref<2x4xf32, #tpu.memory_space<vmem>>, vector<2x4xf32>,
    return
  }
}

</mosaic_0001>

<bundles_post_ra>
// kernel: actor_forward.1
= control target key start
LH: loop header
LB: loop body
LE: loop exit
PB: predicated region body
PF: predicated region fallthrough
CT: control target
= control target key end

     0   :  { %s4184_s0 = inlined_call_operand.vmem [shape: f32[98,36], index: 0, kind: input, shape index: {}]   ;;  %s4185_s1 = inlined_call_operand.vmem [shape: f32[36,32], index: 1, kind: input, shape index: {}]   ;;  %s4186_s2 = inlined_call_operand.vmem [shape: f32[1,32], index: 2, kind: input, shape index: {}]   ;;  %s4187_s3 = inlined_call_operand.vmem [shape: f32[9,50,98], index: 3, kind: input, shape index: {}]   ;;  %s4188_s4 = inlined_call_operand.vmem [shape: f32[9,32,32], index: 4, kind: input, shape index: {}]   ;;  %s4189_s5 = inlined_call_operand.vmem [shape: f32[1,32], index: 5, kind: input, shape index: {}]   ;;  %s4190_s6 = inlined_call_operand.vmem [shape: f32[2,8], index: 6, kind: input, shape index: {}]   ;;  %s4191_s7 = inlined_call_operand.vmem [shape: f32[25,32,32], index: 7, kind: input, shape index: {}]   ;;  %s4192_s8 = inlined_call_operand.vmem [shape: f32[1,32], index: 8, kind: input, shape index: {}]   ;;  %s4193_s9 = inlined_call_operand.vmem [shape: f32[1,32], index: 9, kind: input, shape index: {}]   ;;  %s4194_s10 = inlined_call_operand.vmem [shape: f32[1,32], index: 10, kind: input, shape index: {}]   ;;  %s4195_s11 = inlined_call_operand.vmem [shape: f32[32,32], index: 11, kind: input, shape index: {}]   ;;  %s4196_s12 = inlined_call_operand.vmem [shape: f32[8,32], index: 12, kind: input, shape index: {}]   ;;  %s4197_s13 = inlined_call_operand.vmem [shape: f32[1,32], index: 13, kind: input, shape index: {}]   ;;  %s4198_s14 = inlined_call_operand.vmem [shape: f32[32,32], index: 14, kind: input, shape index: {}]   ;;  %s4199_s15 = inlined_call_operand.vmem [shape: f32[1,32], index: 15, kind: input, shape index: {}]   ;;  %s4200_s16 = inlined_call_operand.vmem [shape: f32[32,4], index: 16, kind: input, shape index: {}]   ;;  %s4201_s17 = inlined_call_operand.vmem [shape: f32[1,4], index: 17, kind: input, shape index: {}]   ;;  %s4202_s18 = inlined_call_operand.vmem [shape: f32[32,4], index: 18, kind: input, shape index: {}]   ;;  %s4203_s19 = inlined_call_operand.vmem [shape: f32[1,4], index: 19, kind: input, shape index: {}]   ;;  %s4204_s20 = inlined_call_operand.hbm [shape: f32[2,4], index: 20, kind: output, shape index: {0}]   ;;  %s4205_s21 = inlined_call_operand.hbm [shape: f32[2,4], index: 21, kind: output, shape index: {1}]  }
   0x1   :  { %4210 = sst [smem:[#allocation9_spill]] %s4184_s0 }
   0x2   :  { %4211 = sst [smem:[#allocation10_spill]] %s4185_s1 }
   0x3   :  { %4212 = sst [smem:[#allocation11_spill]] %s4186_s2 }
   0x4   :  { %4213 = sst [smem:[#allocation12_spill]] %s4187_s3 }
   0x5   :  { %4214 = sst [smem:[#allocation13_spill]] %s4188_s4 }
   0x6   :  { %4215 = sst [smem:[#allocation14_spill]] %s4189_s5 }
   0x7   :  { %27 = vsyncpa [#allocation4], 0  ;;  %s4216_s26 = sld [smem:[#allocation10_spill]]  ;;  %vm131_vm0 = vcmask 1043456  }
   0xd   :  { %v86_v0 = vld [vmem:[%s4216_s26 + $0x20] sm:$0xf]  ;;  %v85_v1 = vld [vmem:[%s4216_s26 + $0x18] sm:$0xff]  ;;  %v84_v2 = vld [vmem:[%s4216_s26 + $0x10] sm:$0xff] }
   0xe   :  { %2445 = vmatpush.msk.msra.mxu0 %vm131_vm0, %v86_v0  ;;  %v83_v3 = vld [vmem:[%s4216_s26 + $0x8] sm:$0xff]  ;;  %v82_v4 = vld [vmem:[%s4216_s26] sm:$0xff] }
  0x10   :  { %147 = vmatpush.msra.mxu0 %v85_v1 }
  0x12   :  { %148 = vmatpush.msra.mxu0 %v84_v2 }
  0x13   :  { %28 = vsyncpa [#allocation6], 0  ;;  %s4217_s1 = sld [smem:[#allocation9_spill]]  ;;  %vm91_vm1 = vcmask 293888   ;;  %vm233_vm2 = vcmask 1041408   ;;  %vm211_vm3 = vcmask 801792  }
  0x14   :  { %149 = vmatpush.msra.mxu0 %v83_v3  ;;  %s4218_s22 = sld [smem:[#allocation11_spill]]  ;;  %vm351_vm4 = vcmask 261120   ;;  %vm1460_vm5 = vcmask 254976   ;;  %vm2260_vm7 = vcmask 64512   ;;  %vm2408_vm11 = vcmask 25600  }
  0x15   :  { %s4219_s24 = sld [smem:[#allocation12_spill]] }
  0x16   :  { %150 = vmatpush.msra.mxu0 %v82_v4  ;;  %s4220_s2 = sld [smem:[#allocation13_spill]] }
  0x17   :  { %s4221_s30 = sld [smem:[#allocation14_spill]] }
  0x19   :  { %v69_v5 = vld [vmem:[%s4217_s1] sm:$0xff]  ;;  %v70_v6 = vld [vmem:[%s4217_s1 + $0x8] sm:$0xff]  ;;  %v71_v7 = vld [vmem:[%s4217_s1 + $0x10] sm:$0xff] }
  0x1a   :  { %2446 = vmatmul.msk.f32.vlgmr.msra.gmra.mxu0 %vm91_vm1, %v69_v5  ;;  %v72_v8 = vld [vmem:[%s4217_s1 + $0x18] sm:$0xff]  ;;  %v73_v9 = vld [vmem:[%s4217_s1 + $0x20] sm:$0xff]  ;;  %v74_v10 = vld [vmem:[%s4217_s1 + $0x28] sm:$0xff] }
  0x1b   :  { %v75_v11 = vld [vmem:[%s4217_s1 + $0x30] sm:$0xff]  ;;  %v76_v12 = vld [vmem:[%s4217_s1 + $0x38] sm:$0xff]  ;;  %v77_v13 = vld [vmem:[%s4217_s1 + $0x40] sm:$0xff] }
  0x1c   :  { %v78_v14 = vld [vmem:[%s4217_s1 + $0x48] sm:$0xff]  ;;  %v79_v15 = vld [vmem:[%s4217_s1 + $0x50] sm:$0xff]  ;;  %v80_v16 = vld [vmem:[%s4217_s1 + $0x58] sm:$0xff] }
  0x1d   :  { %v81_v17 = vld [vmem:[%s4217_s1 + $0x60] sm:$0x3]  ;;  %v2467_v59 = vld [vmem:[%s4219_s24 + $0x38] sm:$0xff]  ;;  %v2526_v60 = vld [vmem:[%s4219_s24 + $0xa8] sm:$0xff] }
  0x1e   :  { %v2811_v30 = vld [vmem:[%s4218_s22] ss:$0 sm:$0xff]  ;;  %v205_v61 = vld [vmem:[%s4219_s24 + $0x8] sm:$0xff]  ;;  %v206_v63 = vld [vmem:[%s4219_s24 + $0x10] sm:$0xff] }
  0x1f   :  { %v204_v58 = vld [vmem:[%s4219_s24] sm:$0xff]  ;;  %v2469_v0 = vld [vmem:[%s4219_s24 + $0x48] sm:$0xff]  ;;  %v207_v1 = vld [vmem:[%s4219_s24 + $0x18] sm:$0xff] }
  0x20   :  { %v2468_v62 = vld [vmem:[%s4219_s24 + $0x40] sm:$0xff]  ;;  %v2470_v2 = vld [vmem:[%s4219_s24 + $0x50] sm:$0xff]  ;;  %v2471_v4 = vld [vmem:[%s4219_s24 + $0x58] sm:$0xff] }
  0x21   :  { %v208_v3 = vld [vmem:[%s4219_s24 + $0x20] sm:$0xff]  ;;  %v209_v5 = vld [vmem:[%s4219_s24 + $0x28] sm:$0xff] }
  0x22   :  { %2447 = vmatmul.msk.f32.gmra.mxu0 %vm91_vm1, %v70_v6  ;;  %v2472_v6 = vld [vmem:[%s4219_s24 + $0x60] sm:$0xff] }
  0x2a   :  { %2448 = vmatmul.msk.f32.gmra.mxu0 %vm91_vm1, %v71_v7  ;;  %v210_v7 = vld [vmem:[%s4219_s24 + $0x30] sm:$0x3] }
  0x32   :  { %2449 = vmatmul.msk.f32.gmra.mxu0 %vm91_vm1, %v72_v8  ;;  %v2473_v8 = vld [vmem:[%s4219_s24 + $0x68] sm:$0x3] }
  0x3a   :  { %2450 = vmatmul.msk.f32.gmra.mxu0 %vm91_vm1, %v73_v9  ;;  %v2500_v9 = vld [vmem:[%s4219_s24 + $0x70] sm:$0xff] }
  0x42   :  { %2451 = vmatmul.msk.f32.gmra.mxu0 %vm91_vm1, %v74_v10  ;;  %v2501_v10 = vld [vmem:[%s4219_s24 + $0x78] sm:$0xff] }
  0x4a   :  { %2452 = vmatmul.msk.f32.gmra.mxu0 %vm91_vm1, %v75_v11  ;;  %v2502_v11 = vld [vmem:[%s4219_s24 + $0x80] sm:$0xff] }
  0x52   :  { %2453 = vmatmul.msk.f32.gmra.mxu0 %vm91_vm1, %v76_v12  ;;  %v2503_v12 = vld [vmem:[%s4219_s24 + $0x88] sm:$0xff] }
  0x5a   :  { %2454 = vmatmul.msk.f32.gmra.mxu0 %vm91_vm1, %v77_v13  ;;  %v2504_v13 = vld [vmem:[%s4219_s24 + $0x90] sm:$0xff] }
  0x62   :  { %2455 = vmatmul.msk.f32.gmra.mxu0 %vm91_vm1, %v78_v14  ;;  %v2505_v14 = vld [vmem:[%s4219_s24 + $0x98] sm:$0xff] }
  0x6a   :  { %2456 = vmatmul.msk.f32.gmra.mxu0 %vm91_vm1, %v79_v15  ;;  %v2485_v15 = vld [vmem:[%s4220_s2 + $0x38] sm:$0xff] }
  0x6b   :  { %385 = vmatpush.msra.mxu3 %v2485_v15 }
  0x72   :  { %2457 = vmatmul.msk.f32.gmra.mxu0 %vm91_vm1, %v80_v16  ;;  %v2527_v16 = vld [vmem:[%s4219_s24 + $0xb0] sm:$0xff] }
  0x7a   :  { %2458 = vmatmul.msk.f32.gmra.mxu0 %vm91_vm1, %v81_v17  ;;  %v2484_v17 = vld [vmem:[%s4220_s2 + $0x30] sm:$0xff] }
  0x7b   :  { %386 = vmatpush.msra.mxu3 %v2484_v17  ;;  %v2631_v17 = vld [vmem:[%s4219_s24 + $0x190] sm:$0xff] }
  0x97   :  { %v3062_v18 = vpop.f32.mrf.mxu0 }
  0x98   :  { %v153_v54 = vadd.f32 %v2811_v30, %v3062_v18  ;;  %v2483_v18 = vld [vmem:[%s4220_s2 + $0x28] sm:$0xff] }
  0x99   :  { %387 = vmatpush.msra.mxu3 %v2483_v18 }
  0x9a   :  { %v3128_v57 = vmax.f32 %v153_v54, 0.0  ;;  %v2580_v54 = vld [vmem:[%s4219_s24 + $0x128] sm:$0xff] }
  0x9f   :  { %v155_v19 = vpop.f32.mrf.mxu0 }
  0xa0   :  { %v156_v52 = vadd.f32 %v2811_v30, %v155_v19  ;;  %v2482_v19 = vld [vmem:[%s4220_s2 + $0x20] sm:$0xff] }
  0xa1   :  { %388 = vmatpush.msra.mxu3 %v2482_v19  ;;  %v2610_v19 = vld [vmem:[%s4219_s24 + $0x180] sm:$0x3] }
  0xa2   :  { %v3123_v56 = vmax.f32 %v156_v52, 0.0  ;;  %v2544_v52 = vld [vmem:[%s4220_s2 + $0x78] sm:$0xff] }
  0xa7   :  { %v158_v20 = vpop.f32.mrf.mxu0 }
  0xa8   :  { %v159_v50 = vadd.f32 %v2811_v30, %v158_v20  ;;  %v278_v20 = vld [vmem:[%s4220_s2 + $0x18] sm:$0xff] }
  0xa9   :  { %444 = vmatpush.msrb.mxu3 %v278_v20 }
  0xaa   :  { %v3118_v55 = vmax.f32 %v159_v50, 0.0  ;;  %v2558_v50 = vld [vmem:[%s4219_s24 + $0x110] sm:$0x3] }
  0xaf   :  { %v161_v21 = vpop.f32.mrf.mxu0 }
  0xb0   :  { %v162_v48 = vadd.f32 %v2811_v30, %v161_v21  ;;  %v2506_v21 = vld [vmem:[%s4219_s24 + $0xa0] sm:$0x3] }
  0xb2   :  { %v3112_v53 = vmax.f32 %v162_v48, 0.0  ;;  %v2579_v48 = vld [vmem:[%s4219_s24 + $0x120] sm:$0xff] }
  0xb7   :  { %v164_v22 = vpop.f32.mrf.mxu0 }
  0xb8   :  { %v165_v46 = vadd.f32 %v2811_v30, %v164_v22  ;;  %v2518_v22 = vld [vmem:[%s4220_s2 + $0x58] sm:$0xff] }
  0xba   :  { %v3107_v51 = vmax.f32 %v165_v46, 0.0 }
  0xbf   :  { %v167_v23 = vpop.f32.mrf.mxu0 }
  0xc0   :  { %v168_v44 = vadd.f32 %v2811_v30, %v167_v23  ;;  %v2528_v23 = vld [vmem:[%s4219_s24 + $0xb8] sm:$0xff] }
  0xc2   :  { %v3102_v49 = vmax.f32 %v168_v44, 0.0  ;;  %v2515_v44 = vld [vmem:[%s4220_s2 + $0x40] sm:$0xff] }
  0xc7   :  { %v170_v24 = vpop.f32.mrf.mxu0 }
  0xc8   :  { %v171_v42 = vadd.f32 %v2811_v30, %v170_v24  ;;  %v2529_v24 = vld [vmem:[%s4219_s24 + $0xc0] sm:$0xff] }
  0xca   :  { %v3097_v47 = vmax.f32 %v171_v42, 0.0  ;;  %v275_v42 = vld [vmem:[%s4220_s2] sm:$0xff] }
  0xcf   :  { %v173_v25 = vpop.f32.mrf.mxu0 }
  0xd0   :  { %v174_v40 = vadd.f32 %v2811_v30, %v173_v25  ;;  %v277_v25 = vld [vmem:[%s4220_s2 + $0x10] sm:$0xff] }
  0xd1   :  { %445 = vmatpush.msrb.mxu3 %v277_v25 }
  0xd2   :  { %v3092_v45 = vmax.f32 %v174_v40, 0.0 }
  0xd7   :  { %v176_v26 = vpop.f32.mrf.mxu0 }
  0xd8   :  { %v177_v38 = vadd.f32 %v2811_v30, %v176_v26  ;;  %v2552_v26 = vld [vmem:[%s4219_s24 + $0xe0] sm:$0xff] }
  0xda   :  { %v3087_v43 = vmax.f32 %v177_v38, 0.0  ;;  %v2532_v38 = vld [vmem:[%s4219_s24 + $0xd8] sm:$0x3] }
  0xdf   :  { %v179_v27 = vpop.f32.mrf.mxu0 }
  0xe0   :  { %v180_v36 = vadd.f32 %v2811_v30, %v179_v27  ;;  %v2517_v27 = vld [vmem:[%s4220_s2 + $0x50] sm:$0xff] }
  0xe2   :  { %v3082_v41 = vmax.f32 %v180_v36, 0.0 }
  0xe7   :  { %v182_v28 = vpop.f32.mrf.mxu0 }
  0xe8   :  { %v183_v34 = vadd.f32 %v2811_v30, %v182_v28  ;;  %v2530_v28 = vld [vmem:[%s4219_s24 + $0xc8] sm:$0xff] }
  0xea   :  { %v3077_v39 = vmax.f32 %v183_v34, 0.0  ;;  %v2516_v34 = vld [vmem:[%s4220_s2 + $0x48] sm:$0xff] }
  0xef   :  { %v185_v29 = vpop.f32.mrf.mxu0 }
  0xf0   :  { %v186_v32 = vadd.f32 %v2811_v30, %v185_v29  ;;  %v2553_v29 = vld [vmem:[%s4219_s24 + $0xe8] sm:$0xff] }
  0xf2   :  { %v3069_v37 = vmax.f32 %v186_v32, 0.0  ;;  %v276_v32 = vld [vmem:[%s4220_s2 + $0x8] sm:$0xff] }
  0xf3   :  { %446 = vmatpush.msrb.mxu3 %v276_v32  ;;  %v2621_v32 = vld [vmem:[%s4220_s2 + $0xd0] sm:$0xff] }
  0xf5   :  { %447 = vmatpush.msrb.mxu3 %v275_v42  ;;  %v2659_v42 = vld [vmem:[%s4219_s24 + $0x1d8] sm:$0xff] }
  0xf7   :  { %v188_v31 = vpop.f32.mrf.mxu0 }
  0xf8   :  { %v189_v33 = vadd.f32 %v2811_v30, %v188_v31  ;;  %v2531_v31 = vld [vmem:[%s4219_s24 + $0xd0] sm:$0xff] }
  0xfa   :  { %v3067_v35 = vmax.f32 %v189_v33, 0.0  ;;  %v2554_v33 = vld [vmem:[%s4219_s24 + $0xf0] sm:$0xff] }
  0xfc   :  { %2459 = vmatpush.msk.msra.mxu1 %vm233_vm2, %v3067_v35  ;;  %2474 = vmatpush.msk.msra.mxu2 %vm233_vm2, %v3067_v35 }
  0xfd   :  { %2533 = vmatpush.msk.msrb.mxu0 %vm233_vm2, %v3067_v35 }
  0xfe   :  { %241 = vmatpush.msra.mxu1 %v3069_v37  ;;  %312 = vmatpush.msra.mxu2 %v3069_v37 }
  0xff   :  { %641 = vmatpush.msrb.mxu0 %v3069_v37 }
 0x100   :  { %242 = vmatpush.msra.mxu1 %v3077_v39  ;;  %313 = vmatpush.msra.mxu2 %v3077_v39 }
 0x101   :  { %642 = vmatpush.msrb.mxu0 %v3077_v39 }
 0x102   :  { %243 = vmatpush.msra.mxu1 %v3082_v41  ;;  %314 = vmatpush.msra.mxu2 %v3082_v41 }
 0x103   :  { %643 = vmatpush.msrb.mxu0 %v3082_v41 }
 0x104   :  { %244 = vmatpush.msra.mxu1 %v3087_v43  ;;  %315 = vmatpush.msra.mxu2 %v3087_v43 }
 0x105   :  { %644 = vmatpush.msrb.mxu0 %v3087_v43 }
 0x106   :  { %245 = vmatpush.msra.mxu1 %v3092_v45  ;;  %316 = vmatpush.msra.mxu2 %v3092_v45 }
 0x107   :  { %645 = vmatpush.msrb.mxu0 %v3092_v45 }
 0x108   :  { %246 = vmatpush.msra.mxu1 %v3097_v47  ;;  %317 = vmatpush.msra.mxu2 %v3097_v47 }
 0x109   :  { %646 = vmatpush.msrb.mxu0 %v3097_v47 }
 0x10a   :  { %247 = vmatpush.msra.mxu1 %v3102_v49  ;;  %318 = vmatpush.msra.mxu2 %v3102_v49 }
 0x10b   :  { %647 = vmatpush.msrb.mxu0 %v3102_v49 }
 0x10c   :  { %248 = vmatpush.msra.mxu1 %v3107_v51  ;;  %319 = vmatpush.msra.mxu2 %v3107_v51 }
 0x10d   :  { %648 = vmatpush.msrb.mxu0 %v3107_v51 }
 0x10e   :  { %249 = vmatpush.msra.mxu1 %v3112_v53  ;;  %320 = vmatpush.msra.mxu2 %v3112_v53 }
 0x10f   :  { %649 = vmatpush.msrb.mxu0 %v3112_v53 }
 0x110   :  { %250 = vmatpush.msra.mxu1 %v3118_v55  ;;  %321 = vmatpush.msra.mxu2 %v3118_v55 }
 0x111   :  { %650 = vmatpush.msrb.mxu0 %v3118_v55 }
 0x112   :  { %251 = vmatpush.msra.mxu1 %v3123_v56  ;;  %322 = vmatpush.msra.mxu2 %v3123_v56 }
 0x113   :  { %651 = vmatpush.msrb.mxu0 %v3123_v56 }
 0x114   :  { %252 = vmatpush.msra.mxu1 %v3128_v57  ;;  %323 = vmatpush.msra.mxu2 %v3128_v57 }
 0x115   :  { %652 = vmatpush.msrb.mxu0 %v3128_v57  ;;  %2460 = vmatmul.msk.f32.vlgmr.msra.gmra.mxu1 %vm211_vm3, %v204_v58  ;;  %v2581_v58 = vld [vmem:[%s4219_s24 + $0x130] sm:$0xff] }
 0x116   :  { %2475 = vmatmul.msk.f32.vlgmr.msra.gmra.mxu2 %vm211_vm3, %v2467_v59  ;;  %2507 = vmatpush.msk.msrb.mxu1 %vm233_vm2, %v3067_v35  ;;  %v2543_v59 = vld [vmem:[%s4220_s2 + $0x70] sm:$0xff] }
 0x117   :  { %2585 = vmatpush.msk.msra.mxu0 %vm233_vm2, %v3067_v35  ;;  %575 = vmatpush.msrb.mxu2 %v2518_v22  ;;  %v2622_v22 = vld [vmem:[%s4220_s2 + $0xd8] sm:$0xff] }
 0x118   :  { %503 = vmatpush.msrb.mxu1 %v3069_v37  ;;  %2534 = vmatmul.msk.f32.vlgmr.msrb.gmra.mxu0 %vm211_vm3, %v2526_v60 }
 0x119   :  { %917 = vmatpush.msra.mxu0 %v3069_v37  ;;  %576 = vmatpush.msrb.mxu2 %v2517_v27  ;;  %v2633_v27 = vld [vmem:[%s4219_s24 + $0x1a0] sm:$0xff] }
 0x11a   :  { %504 = vmatpush.msrb.mxu1 %v3077_v39 }
 0x11b   :  { %918 = vmatpush.msra.mxu0 %v3077_v39  ;;  %577 = vmatpush.msrb.mxu2 %v2516_v34 }
 0x11c   :  { %505 = vmatpush.msrb.mxu1 %v3082_v41 }
 0x11d   :  { %919 = vmatpush.msra.mxu0 %v3082_v41  ;;  %2461 = vmatmul.msk.f32.gmra.mxu1 %vm211_vm3, %v205_v61 }
 0x11e   :  { %2476 = vmatmul.msk.f32.gmra.mxu2 %vm211_vm3, %v2468_v62  ;;  %506 = vmatpush.msrb.mxu1 %v3087_v43  ;;  %v2605_v62 = vld [vmem:[%s4219_s24 + $0x158] sm:$0xff] }
 0x11f   :  { %920 = vmatpush.msra.mxu0 %v3087_v43  ;;  %578 = vmatpush.msrb.mxu2 %v2515_v44 }
 0x120   :  { %507 = vmatpush.msrb.mxu1 %v3092_v45  ;;  %2535 = vmatmul.msk.f32.gmra.mxu0 %vm211_vm3, %v2527_v16  ;;  %v2609_v16 = vld [vmem:[%s4219_s24 + $0x178] sm:$0xff] }
 0x121   :  { %921 = vmatpush.msra.mxu0 %v3092_v45 }
 0x122   :  { %508 = vmatpush.msrb.mxu1 %v3097_v47 }
 0x123   :  { %922 = vmatpush.msra.mxu0 %v3097_v47 }
 0x124   :  { %509 = vmatpush.msrb.mxu1 %v3102_v49 }
 0x125   :  { %923 = vmatpush.msra.mxu0 %v3102_v49  ;;  %2462 = vmatmul.msk.f32.gmra.mxu1 %vm211_vm3, %v206_v63  ;;  %v2569_v63 = vld [vmem:[%s4220_s2 + $0x90] sm:$0xff] }
 0x126   :  { %2477 = vmatmul.msk.f32.gmra.mxu2 %vm211_vm3, %v2469_v0  ;;  %510 = vmatpush.msrb.mxu1 %v3107_v51  ;;  %v2582_v0 = vld [vmem:[%s4219_s24 + $0x138] sm:$0xff] }
 0x127   :  { %924 = vmatpush.msra.mxu0 %v3107_v51 }
 0x128   :  { %511 = vmatpush.msrb.mxu1 %v3112_v53  ;;  %2536 = vmatmul.msk.f32.gmra.mxu0 %vm211_vm3, %v2528_v23  ;;  %v2632_v23 = vld [vmem:[%s4219_s24 + $0x198] sm:$0xff] }
 0x129   :  { %925 = vmatpush.msra.mxu0 %v3112_v53 }
 0x12a   :  { %512 = vmatpush.msrb.mxu1 %v3118_v55 }
 0x12b   :  { %926 = vmatpush.msra.mxu0 %v3118_v55 }
 0x12c   :  { %513 = vmatpush.msrb.mxu1 %v3123_v56 }
 0x12d   :  { %927 = vmatpush.msra.mxu0 %v3123_v56  ;;  %2463 = vmatmul.msk.f32.gmra.mxu1 %vm211_vm3, %v207_v1 }
 0x12e   :  { %2478 = vmatmul.msk.f32.gmra.mxu2 %vm211_vm3, %v2470_v2  ;;  %514 = vmatpush.msrb.mxu1 %v3128_v57 }
 0x12f   :  { %928 = vmatpush.msra.mxu0 %v3128_v57 }
 0x130   :  { %2559 = vmatpush.msk.msra.mxu1 %vm233_vm2, %v3067_v35  ;;  %2537 = vmatmul.msk.f32.gmra.mxu0 %vm211_vm3, %v2529_v24 }
 0x131   :  { %2637 = vmatpush.msk.msrb.mxu0 %vm233_vm2, %v3067_v35 }
 0x132   :  { %779 = vmatpush.msra.mxu1 %v3069_v37 }
 0x133   :  { %1193 = vmatpush.msrb.mxu0 %v3069_v37 }
 0x134   :  { %780 = vmatpush.msra.mxu1 %v3077_v39 }
 0x135   :  { %1194 = vmatpush.msrb.mxu0 %v3077_v39  ;;  %2464 = vmatmul.msk.f32.gmra.mxu1 %vm211_vm3, %v208_v3  ;;  %v2606_v3 = vld [vmem:[%s4219_s24 + $0x160] sm:$0xff] }
 0x136   :  { %781 = vmatpush.msra.mxu1 %v3082_v41  ;;  %2479 = vmatmul.msk.f32.gmra.mxu2 %vm211_vm3, %v2471_v4  ;;  %v2583_v4 = vld [vmem:[%s4219_s24 + $0x140] sm:$0xff] }
 0x137   :  { %1195 = vmatpush.msrb.mxu0 %v3082_v41 }
 0x138   :  { %782 = vmatpush.msra.mxu1 %v3087_v43  ;;  %2538 = vmatmul.msk.f32.gmra.mxu0 %vm211_vm3, %v2530_v28  ;;  %v2595_v28 = vld [vmem:[%s4220_s2 + $0xb0] sm:$0xff] }
 0x139   :  { %1196 = vmatpush.msrb.mxu0 %v3087_v43 }
 0x13a   :  { %783 = vmatpush.msra.mxu1 %v3092_v45 }
 0x13b   :  { %1197 = vmatpush.msrb.mxu0 %v3092_v45 }
 0x13c   :  { %784 = vmatpush.msra.mxu1 %v3097_v47 }
 0x13d   :  { %1198 = vmatpush.msrb.mxu0 %v3097_v47  ;;  %2465 = vmatmul.msk.f32.gmra.mxu1 %vm211_vm3, %v209_v5  ;;  %v2542_v5 = vld [vmem:[%s4220_s2 + $0x68] sm:$0xff] }
 0x13e   :  { %785 = vmatpush.msra.mxu1 %v3102_v49  ;;  %2480 = vmatmul.msk.f32.gmra.mxu2 %vm211_vm3, %v2472_v6  ;;  %v2568_v6 = vld [vmem:[%s4220_s2 + $0x88] sm:$0xff] }
 0x13f   :  { %1199 = vmatpush.msrb.mxu0 %v3102_v49 }
 0x140   :  { %786 = vmatpush.msra.mxu1 %v3107_v51  ;;  %2539 = vmatmul.msk.f32.gmra.mxu0 %vm211_vm3, %v2531_v31  ;;  %v2657_v31 = vld [vmem:[%s4219_s24 + $0x1c8] sm:$0xff] }
 0x141   :  { %1200 = vmatpush.msrb.mxu0 %v3107_v51 }
 0x142   :  { %787 = vmatpush.msra.mxu1 %v3112_v53 }
 0x143   :  { %1201 = vmatpush.msrb.mxu0 %v3112_v53 }
 0x144   :  { %788 = vmatpush.msra.mxu1 %v3118_v55 }
 0x145   :  { %1202 = vmatpush.msrb.mxu0 %v3118_v55  ;;  %2466 = vmatmul.msk.f32.gmra.mxu1 %vm211_vm3, %v210_v7 }
 0x146   :  { %789 = vmatpush.msra.mxu1 %v3123_v56  ;;  %2481 = vmatmul.msk.f32.gmra.mxu2 %vm211_vm3, %v2473_v8  ;;  %v2607_v8 = vld [vmem:[%s4219_s24 + $0x168] sm:$0xff] }
 0x147   :  { %1203 = vmatpush.msrb.mxu0 %v3123_v56 }
 0x148   :  { %790 = vmatpush.msra.mxu1 %v3128_v57  ;;  %2540 = vmatmul.msk.f32.gmra.mxu0 %vm211_vm3, %v2532_v38  ;;  %v2594_v38 = vld [vmem:[%s4220_s2 + $0xa8] sm:$0xff] }
 0x149   :  { %1204 = vmatpush.msrb.mxu0 %v3128_v57 }
 0x14d   :  { %2508 = vmatmul.msk.f32.vlgmr.msrb.gmra.mxu1 %vm211_vm3, %v2500_v9  ;;  %v2584_v9 = vld [vmem:[%s4219_s24 + $0x148] sm:$0x3] }
 0x14e   :  { %2611 = vmatpush.msk.msrb.mxu1 %vm233_vm2, %v3067_v35 }
 0x150   :  { %1055 = vmatpush.msrb.mxu1 %v3069_v37 }
 0x152   :  { %1056 = vmatpush.msrb.mxu1 %v3077_v39 }
 0x154   :  { %1057 = vmatpush.msrb.mxu1 %v3082_v41 }
 0x155   :  { %2509 = vmatmul.msk.f32.gmra.mxu1 %vm211_vm3, %v2501_v10  ;;  %v2608_v10 = vld [vmem:[%s4219_s24 + $0x170] sm:$0xff] }
 0x156   :  { %1058 = vmatpush.msrb.mxu1 %v3087_v43 }
 0x158   :  { %1059 = vmatpush.msrb.mxu1 %v3092_v45 }
 0x15a   :  { %1060 = vmatpush.msrb.mxu1 %v3097_v47 }
 0x15c   :  { %1061 = vmatpush.msrb.mxu1 %v3102_v49 }
 0x15d   :  { %2510 = vmatmul.msk.f32.gmra.mxu1 %vm211_vm3, %v2502_v11 }
 0x15e   :  { %1062 = vmatpush.msrb.mxu1 %v3107_v51 }
 0x160   :  { %1063 = vmatpush.msrb.mxu1 %v3112_v53 }
 0x162   :  { %1064 = vmatpush.msrb.mxu1 %v3118_v55 }
 0x164   :  { %1065 = vmatpush.msrb.mxu1 %v3123_v56 }
 0x165   :  { %2511 = vmatmul.msk.f32.gmra.mxu1 %vm211_vm3, %v2503_v12  ;;  %v2541_v12 = vld [vmem:[%s4220_s2 + $0x60] sm:$0xff] }
 0x166   :  { %1066 = vmatpush.msrb.mxu1 %v3128_v57 }
 0x16d   :  { %2512 = vmatmul.msk.f32.gmra.mxu1 %vm211_vm3, %v2504_v13  ;;  %v2630_v13 = vld [vmem:[%s4219_s24 + $0x188] sm:$0xff] }
 0x175   :  { %2513 = vmatmul.msk.f32.gmra.mxu1 %vm211_vm3, %v2505_v14  ;;  %v2567_v14 = vld [vmem:[%s4220_s2 + $0x80] sm:$0xff] }
 0x17d   :  { %2514 = vmatmul.msk.f32.gmra.mxu1 %vm211_vm3, %v2506_v21  ;;  %v2596_v21 = vld [vmem:[%s4220_s2 + $0xb8] sm:$0xff] }
 0x185   :  { %2560 = vmatmul.msk.f32.vlgmr.msra.gmra.mxu1 %vm211_vm3, %v2552_v26  ;;  %v2656_v26 = vld [vmem:[%s4219_s24 + $0x1c0] sm:$0xff] }
 0x186   :  { %2663 = vmatpush.msk.msra.mxu1 %vm233_vm2, %v3067_v35 }
 0x188   :  { %1331 = vmatpush.msra.mxu1 %v3069_v37  ;;  %v2555_v37 = vld [vmem:[%s4219_s24 + $0xf8] sm:$0xff] }
 0x18a   :  { %1332 = vmatpush.msra.mxu1 %v3077_v39 }
 0x18c   :  { %1333 = vmatpush.msra.mxu1 %v3082_v41  ;;  %v2556_v41 = vld [vmem:[%s4219_s24 + $0x100] sm:$0xff] }
 0x18d   :  { %2561 = vmatmul.msk.f32.gmra.mxu1 %vm211_vm3, %v2553_v29 }
 0x18e   :  { %1334 = vmatpush.msra.mxu1 %v3087_v43  ;;  %v2578_v43 = vld [vmem:[%s4219_s24 + $0x118] sm:$0xff] }
 0x18f   :  { %2586 = vmatmul.msk.f32.vlgmr.msra.gmra.mxu0 %vm211_vm3, %v2578_v43  ;;  %v2636_v43 = vld [vmem:[%s4219_s24 + $0x1b8] sm:$0x3] }
 0x190   :  { %1335 = vmatpush.msra.mxu1 %v3092_v45 }
 0x192   :  { %v3349_v30 = vpop.f32.mrf.mxu1  ;;  %1336 = vmatpush.msra.mxu1 %v3097_v47  ;;  %v2557_v47 = vld [vmem:[%s4219_s24 + $0x108] sm:$0xff] }
 0x194   :  { %1337 = vmatpush.msra.mxu1 %v3102_v49 }
 0x195   :  { %2562 = vmatmul.msk.f32.gmra.mxu1 %vm211_vm3, %v2554_v33  ;;  %v654_v18 = vpop.f32.mrf.mxu0  ;;  %v2634_v33 = vld [vmem:[%s4219_s24 + $0x1a8] sm:$0xff] }
 0x196   :  { %1338 = vmatpush.msra.mxu1 %v3107_v51 }
 0x197   :  { %2587 = vmatmul.msk.f32.gmra.mxu0 %vm211_vm3, %v2579_v48  ;;  %v2619_v48 = vld [vmem:[%s4220_s2 + $0xc0] sm:$0xff] }
 0x198   :  { %1339 = vmatpush.msra.mxu1 %v3112_v53  ;;  %v2570_v53 = vld [vmem:[%s4220_s2 + $0x98] sm:$0xff] }
 0x199   :  { %v325_v35 = vpop.f32.mrf.mxu2  ;;  %851 = vmatpush.msra.mxu2 %v2570_v53 }
 0x19a   :  { %2486 = vmatmul.msk.f32.vlgmr.msra.gmra.mxu3 %vm351_vm4, %v325_v35  ;;  %v3370_v36 = vpop.f32.mrf.mxu1  ;;  %1340 = vmatpush.msra.mxu1 %v3118_v55 }
 0x19b   :  { %713 = vmatpush.msra.mxu3 %v2544_v52  ;;  %852 = vmatpush.msra.mxu2 %v2569_v63 }
 0x19c   :  { %1341 = vmatpush.msra.mxu1 %v3123_v56 }
 0x19d   :  { %2563 = vmatmul.msk.f32.gmra.mxu1 %vm211_vm3, %v2555_v37  ;;  %714 = vmatpush.msra.mxu3 %v2543_v59  ;;  %v657_v24 = vpop.f32.mrf.mxu0  ;;  %v2635_v37 = vld [vmem:[%s4219_s24 + $0x1b0] sm:$0xff] }
 0x19e   :  { %1342 = vmatpush.msra.mxu1 %v3128_v57  ;;  %v2604_v57 = vld [vmem:[%s4219_s24 + $0x150] sm:$0xff]  ;;  %853 = vmatpush.msra.mxu2 %v2568_v6  ;;  %v2672_v6 = vld [vmem:[%s4220_s2 + $0x108] sm:$0xff] }
 0x19f   :  { %2588 = vmatmul.msk.f32.gmra.mxu0 %vm211_vm3, %v2580_v54  ;;  %715 = vmatpush.msra.mxu3 %v2542_v5  ;;  %v2662_v54 = vld [vmem:[%s4219_s24 + $0x1f0] sm:$0x3]  ;;  %v2646_v5 = vld [vmem:[%s4220_s2 + $0xe8] sm:$0xff] }
 0x1a0   :  { %854 = vmatpush.msra.mxu2 %v2567_v14 }
 0x1a1   :  { %v328_v39 = vpop.f32.mrf.mxu2  ;;  %716 = vmatpush.msra.mxu3 %v2541_v12 }
 0x1a2   :  { %2487 = vmatmul.msk.f32.gmra.mxu3 %vm351_vm4, %v328_v39  ;;  %v3384_v40 = vpop.f32.mrf.mxu1  ;;  %v2620_v39 = vld [vmem:[%s4220_s2 + $0xc8] sm:$0xff] }
 0x1a5   :  { %2564 = vmatmul.msk.f32.gmra.mxu1 %vm211_vm3, %v2556_v41  ;;  %v660_v29 = vpop.f32.mrf.mxu0 }
 0x1a7   :  { %2589 = vmatmul.msk.f32.gmra.mxu0 %vm211_vm3, %v2581_v58 }
 0x1a9   :  { %v331_v45 = vpop.f32.mrf.mxu2 }
 0x1aa   :  { %2488 = vmatmul.msk.f32.gmra.mxu3 %vm351_vm4, %v331_v45  ;;  %v3401_v46 = vpop.f32.mrf.mxu1 }
 0x1ad   :  { %2565 = vmatmul.msk.f32.gmra.mxu1 %vm211_vm3, %v2557_v47  ;;  %v663_v34 = vpop.f32.mrf.mxu0  ;;  %v2593_v47 = vld [vmem:[%s4220_s2 + $0xa0] sm:$0xff] }
 0x1af   :  { %2590 = vmatmul.msk.f32.gmra.mxu0 %vm211_vm3, %v2582_v0  ;;  %v2673_v0 = vld [vmem:[%s4220_s2 + $0x110] sm:$0xff] }
 0x1b1   :  { %v334_v49 = vpop.f32.mrf.mxu2 }
 0x1b2   :  { %2489 = vmatmul.msk.f32.gmra.mxu3 %vm351_vm4, %v334_v49  ;;  %v3415_v51 = vpop.f32.mrf.mxu1 }
 0x1b5   :  { %2566 = vmatmul.msk.f32.gmra.mxu1 %vm211_vm3, %v2558_v50  ;;  %v2661_v50 = vld [vmem:[%s4219_s24 + $0x1e8] sm:$0xff] }
 0x1b7   :  { %2591 = vmatmul.msk.f32.gmra.mxu0 %vm211_vm3, %v2583_v4 }
 0x1b9   :  { %v337_v55 = vpop.f32.mrf.mxu2 }
 0x1ba   :  { %2490 = vmatmul.msk.f32.gmra.mxu3 %vm351_vm4, %v337_v55  ;;  %v3429_v56 = vpop.f32.mrf.mxu1  ;;  %v2648_v55 = vld [vmem:[%s4220_s2 + $0xf8] sm:$0xff] }
 0x1bd   :  { %2612 = vmatmul.msk.f32.vlgmr.msrb.gmra.mxu1 %vm211_vm3, %v2604_v57 }
 0x1bf   :  { %2592 = vmatmul.msk.f32.gmra.mxu0 %vm211_vm3, %v2584_v9 }
 0x1c1   :  { %v340_v60 = vpop.f32.mrf.mxu2 }
 0x1c2   :  { %2491 = vmatmul.msk.f32.gmra.mxu3 %vm351_vm4, %v340_v60  ;;  %v3443_v61 = vpop.f32.mrf.mxu1 }
 0x1c5   :  { %2613 = vmatmul.msk.f32.gmra.mxu1 %vm211_vm3, %v2605_v62 }
 0x1c7   :  { %2638 = vmatmul.msk.f32.vlgmr.msrb.gmra.mxu0 %vm211_vm3, %v2630_v13 }
 0x1c9   :  { %v343_v1 = vpop.f32.mrf.mxu2 }
 0x1ca   :  { %2492 = vmatmul.msk.f32.gmra.mxu3 %vm351_vm4, %v343_v1  ;;  %v516_v2 = vpop.f32.mrf.mxu1 }
 0x1cb   :  { %2519 = vmatmul.msk.f32.vlgmr.msrb.gmra.mxu2 %vm351_vm4, %v516_v2 }
 0x1cc   :  { %1127 = vmatpush.msrb.mxu2 %v2622_v22 }
 0x1cd   :  { %2614 = vmatmul.msk.f32.gmra.mxu1 %vm211_vm3, %v2606_v3 }
 0x1ce   :  { %1128 = vmatpush.msrb.mxu2 %v2621_v32 }
 0x1cf   :  { %2639 = vmatmul.msk.f32.gmra.mxu0 %vm211_vm3, %v2631_v17 }
 0x1d0   :  { %1129 = vmatpush.msrb.mxu2 %v2620_v39 }
 0x1d2   :  { %2493 = vmatmul.msk.f32.vlgmr.msrb.gmra.mxu3 %vm351_vm4, %v3349_v30  ;;  %v519_v7 = vpop.f32.mrf.mxu1  ;;  %1130 = vmatpush.msrb.mxu2 %v2619_v48 }
 0x1d3   :  { %2520 = vmatmul.msk.f32.gmra.mxu2 %vm351_vm4, %v519_v7  ;;  %989 = vmatpush.msrb.mxu3 %v2596_v21 }
 0x1d5   :  { %2615 = vmatmul.msk.f32.gmra.mxu1 %vm211_vm3, %v2607_v8  ;;  %990 = vmatpush.msrb.mxu3 %v2595_v28 }
 0x1d7   :  { %2640 = vmatmul.msk.f32.gmra.mxu0 %vm211_vm3, %v2632_v23  ;;  %991 = vmatpush.msrb.mxu3 %v2594_v38 }
 0x1d9   :  { %992 = vmatpush.msrb.mxu3 %v2593_v47 }
 0x1da   :  { %2494 = vmatmul.msk.f32.gmra.mxu3 %vm351_vm4, %v3370_v36  ;;  %v522_v11 = vpop.f32.mrf.mxu1  ;;  %v2658_v36 = vld [vmem:[%s4219_s24 + $0x1d0] sm:$0xff] }
 0x1db   :  { %2521 = vmatmul.msk.f32.gmra.mxu2 %vm351_vm4, %v522_v11  ;;  %v2645_v11 = vld [vmem:[%s4220_s2 + $0xe0] sm:$0xff] }
 0x1dd   :  { %2616 = vmatmul.msk.f32.gmra.mxu1 %vm211_vm3, %v2608_v10 }
 0x1df   :  { %2641 = vmatmul.msk.f32.gmra.mxu0 %vm211_vm3, %v2633_v27 }
 0x1e2   :  { %2495 = vmatmul.msk.f32.gmra.mxu3 %vm351_vm4, %v3384_v40  ;;  %v525_v15 = vpop.f32.mrf.mxu1  ;;  %v666_v40 = vpop.f32.mrf.mxu0 }
 0x1e3   :  { %2522 = vmatmul.msk.f32.gmra.mxu2 %vm351_vm4, %v525_v15  ;;  %v2671_v15 = vld [vmem:[%s4220_s2 + $0x100] sm:$0xff] }
 0x1e5   :  { %2617 = vmatmul.msk.f32.gmra.mxu1 %vm211_vm3, %v2609_v16 }
 0x1e7   :  { %2642 = vmatmul.msk.f32.gmra.mxu0 %vm211_vm3, %v2634_v33 }
 0x1ea   :  { %2496 = vmatmul.msk.f32.gmra.mxu3 %vm351_vm4, %v3401_v46  ;;  %v528_v20 = vpop.f32.mrf.mxu1  ;;  %v669_v44 = vpop.f32.mrf.mxu0  ;;  %v2660_v46 = vld [vmem:[%s4219_s24 + $0x1e0] sm:$0xff] }
 0x1eb   :  { %2523 = vmatmul.msk.f32.gmra.mxu2 %vm351_vm4, %v528_v20 }
 0x1ed   :  { %2618 = vmatmul.msk.f32.gmra.mxu1 %vm211_vm3, %v2610_v19 }
 0x1ef   :  { %2643 = vmatmul.msk.f32.gmra.mxu0 %vm211_vm3, %v2635_v37 }
 0x1f2   :  { %2497 = vmatmul.msk.f32.gmra.mxu3 %vm351_vm4, %v3415_v51  ;;  %v531_v25 = vpop.f32.mrf.mxu1  ;;  %v672_v51 = vpop.f32.mrf.mxu0 }
 0x1f3   :  { %2524 = vmatmul.msk.f32.gmra.mxu2 %vm351_vm4, %v531_v25 }
 0x1f5   :  { %2664 = vmatmul.msk.f32.vlgmr.msra.gmra.mxu1 %vm211_vm3, %v2656_v26 }
 0x1f7   :  { %2644 = vmatmul.msk.f32.gmra.mxu0 %vm211_vm3, %v2636_v43 }
 0x1fa   :  { %2498 = vmatmul.msk.f32.gmra.mxu3 %vm351_vm4, %v3429_v56  ;;  %v534_v30 = vpop.f32.mrf.mxu1  ;;  %v2674_v56 = vld [vmem:[%s4220_s2 + $0x118] sm:$0xff] }
 0x1fb   :  { %2525 = vmatmul.msk.f32.gmra.mxu2 %vm351_vm4, %v534_v30 }
 0x1fd   :  { %2665 = vmatmul.msk.f32.gmra.mxu1 %vm211_vm3, %v2657_v31 }
 0x202   :  { %2499 = vmatmul.msk.f32.gmra.mxu3 %vm351_vm4, %v3443_v61  ;;  %v792_v35 = vpop.f32.mrf.mxu1  ;;  %v2647_v61 = vld [vmem:[%s4220_s2 + $0xf0] sm:$0xff] }
 0x203   :  { %2571 = vmatmul.msk.f32.vlgmr.msra.gmra.mxu2 %vm351_vm4, %v792_v35 }
 0x204   :  { %1403 = vmatpush.msra.mxu2 %v2674_v56 }
 0x205   :  { %2666 = vmatmul.msk.f32.gmra.mxu1 %vm211_vm3, %v2658_v36 }
 0x206   :  { %1404 = vmatpush.msra.mxu2 %v2673_v0 }
 0x208   :  { %1405 = vmatpush.msra.mxu2 %v2672_v6 }
 0x20a   :  { %2545 = vmatmul.msk.f32.vlgmr.msra.gmra.mxu3 %vm351_vm4, %v654_v18  ;;  %v795_v41 = vpop.f32.mrf.mxu1  ;;  %1406 = vmatpush.msra.mxu2 %v2671_v15 }
 0x20b   :  { %2572 = vmatmul.msk.f32.gmra.mxu2 %vm351_vm4, %v795_v41  ;;  %1265 = vmatpush.msra.mxu3 %v2648_v55 }
 0x20c   :  { %v930_v58 = vpop.f32.mrf.mxu0 }
 0x20d   :  { %2667 = vmatmul.msk.f32.gmra.mxu1 %vm211_vm3, %v2659_v42  ;;  %1266 = vmatpush.msra.mxu3 %v2647_v61 }
 0x20f   :  { %1267 = vmatpush.msra.mxu3 %v2646_v5 }
 0x211   :  { %1268 = vmatpush.msra.mxu3 %v2645_v11 }
 0x212   :  { %2546 = vmatmul.msk.f32.gmra.mxu3 %vm351_vm4, %v657_v24  ;;  %v798_v45 = vpop.f32.mrf.mxu1 }
 0x213   :  { %2573 = vmatmul.msk.f32.gmra.mxu2 %vm351_vm4, %v798_v45 }
 0x214   :  { %v933_v62 = vpop.f32.mrf.mxu0 }
 0x215   :  { %2668 = vmatmul.msk.f32.gmra.mxu1 %vm211_vm3, %v2660_v46 }
 0x21a   :  { %2547 = vmatmul.msk.f32.gmra.mxu3 %vm351_vm4, %v660_v29  ;;  %v801_v49 = vpop.f32.mrf.mxu1 }
 0x21b   :  { %2574 = vmatmul.msk.f32.gmra.mxu2 %vm351_vm4, %v801_v49 }
 0x21c   :  { %v936_v2 = vpop.f32.mrf.mxu0 }
 0x21d   :  { %v390_v52 = vpop.f32.mrf.mxu3  ;;  %2669 = vmatmul.msk.f32.gmra.mxu1 %vm211_vm3, %v2661_v50 }
 0x222   :  { %2548 = vmatmul.msk.f32.gmra.mxu3 %vm351_vm4, %v663_v34  ;;  %v804_v53 = vpop.f32.mrf.mxu1 }
 0x223   :  { %2575 = vmatmul.msk.f32.gmra.mxu2 %vm351_vm4, %v804_v53 }
 0x224   :  { %v939_v8 = vpop.f32.mrf.mxu0 }
 0x225   :  { %v393_v57 = vpop.f32.mrf.mxu3  ;;  %2670 = vmatmul.msk.f32.gmra.mxu1 %vm211_vm3, %v2662_v54 }
 0x22a   :  { %2549 = vmatmul.msk.f32.gmra.mxu3 %vm351_vm4, %v666_v40  ;;  %v807_v59 = vpop.f32.mrf.mxu1 }
 0x22b   :  { %2576 = vmatmul.msk.f32.gmra.mxu2 %vm351_vm4, %v807_v59 }
 0x22c   :  { %v942_v13 = vpop.f32.mrf.mxu0 }
 0x22d   :  { %v396_v60 = vpop.f32.mrf.mxu3 }
 0x232   :  { %2550 = vmatmul.msk.f32.gmra.mxu3 %vm351_vm4, %v669_v44  ;;  %v810_v63 = vpop.f32.mrf.mxu1 }
 0x233   :  { %2577 = vmatmul.msk.f32.gmra.mxu2 %vm351_vm4, %v810_v63 }
 0x234   :  { %v945_v20 = vpop.f32.mrf.mxu0 }
 0x235   :  { %v399_v1 = vpop.f32.mrf.mxu3 }
 0x23a   :  { %2551 = vmatmul.msk.f32.gmra.mxu3 %vm351_vm4, %v672_v51  ;;  %v1068_v3 = vpop.f32.mrf.mxu1 }
 0x23b   :  { %2623 = vmatmul.msk.f32.vlgmr.msrb.gmra.mxu2 %vm351_vm4, %v1068_v3 }
 0x23c   :  { %v948_v27 = vpop.f32.mrf.mxu0 }
 0x23d   :  { %v3625_v4 = vpop.f32.mrf.mxu3 }
 0x242   :  { %2597 = vmatmul.msk.f32.vlgmr.msrb.gmra.mxu3 %vm351_vm4, %v930_v58  ;;  %v1071_v7 = vpop.f32.mrf.mxu1 }
 0x243   :  { %2624 = vmatmul.msk.f32.gmra.mxu2 %vm351_vm4, %v1071_v7 }
 0x244   :  { %v1206_v34 = vpop.f32.mrf.mxu0 }
 0x245   :  { %v3635_v9 = vpop.f32.mrf.mxu3 }
 0x24a   :  { %2598 = vmatmul.msk.f32.gmra.mxu3 %vm351_vm4, %v933_v62  ;;  %v1074_v10 = vpop.f32.mrf.mxu1 }
 0x24b   :  { %2625 = vmatmul.msk.f32.gmra.mxu2 %vm351_vm4, %v1074_v10 }
 0x24c   :  { %v1209_v41 = vpop.f32.mrf.mxu0 }
 0x24d   :  { %v3642_v12 = vpop.f32.mrf.mxu3 }
 0x24e   :  { %v580_v14 = vpop.f32.mrf.mxu2 }
 0x252   :  { %2599 = vmatmul.msk.f32.gmra.mxu3 %vm351_vm4, %v936_v2  ;;  %v1077_v16 = vpop.f32.mrf.mxu1 }
 0x253   :  { %2626 = vmatmul.msk.f32.gmra.mxu2 %vm351_vm4, %v1077_v16 }
 0x254   :  { %v1212_v46 = vpop.f32.mrf.mxu0 }
 0x255   :  { %v449_v17 = vpop.f32.mrf.mxu3 }
 0x256   :  { %v450_v18 = vadd.f32 %v449_v17, %v390_v52  ;;  %v583_v19 = vpop.f32.mrf.mxu2 }
 0x258   :  { %v3649_v21 = vadd.f32 %v580_v14, %v450_v18  ;;  %v1466_v18 = vld [vmem:[%s4191_s7 + $0x18] sm:$0xff] }
 0x259   :  { %1511 = vmatpush.msrb.mxu3 %v1466_v18  ;;  %v2741_v18 = vld [vmem:[%s4191_s7 + $0x198] sm:$0xff] }
 0x25a   :  { %2600 = vmatmul.msk.f32.gmra.mxu3 %vm351_vm4, %v939_v8  ;;  %v1080_v22 = vpop.f32.mrf.mxu1 }
 0x25b   :  { %2627 = vmatmul.msk.f32.gmra.mxu2 %vm351_vm4, %v1080_v22 }
 0x25c   :  { %v1215_v50 = vpop.f32.mrf.mxu0 }
 0x25d   :  { %v452_v23 = vpop.f32.mrf.mxu3 }
 0x25e   :  { %v453_v24 = vadd.f32 %v452_v23, %v393_v57  ;;  %v586_v25 = vpop.f32.mrf.mxu2 }
 0x260   :  { %v3653_v26 = vadd.f32 %v583_v19, %v453_v24 }
 0x262   :  { %2601 = vmatmul.msk.f32.gmra.mxu3 %vm351_vm4, %v942_v13  ;;  %v1083_v28 = vpop.f32.mrf.mxu1 }
 0x263   :  { %2628 = vmatmul.msk.f32.gmra.mxu2 %vm351_vm4, %v1083_v28  ;;  %v1465_v28 = vld [vmem:[%s4191_s7 + $0x10] sm:$0xff] }
 0x264   :  { %v1218_v55 = vpop.f32.mrf.mxu0  ;;  %1512 = vmatpush.msrb.mxu3 %v1465_v28 }
 0x265   :  { %v455_v29 = vpop.f32.mrf.mxu3 }
 0x266   :  { %v456_v30 = vadd.f32 %v455_v29, %v396_v60  ;;  %v589_v31 = vpop.f32.mrf.mxu2 }
 0x268   :  { %v3657_v32 = vadd.f32 %v586_v25, %v456_v30  ;;  %v2721_v30 = vld [vmem:[%s4191_s7 + $0x118] sm:$0xff] }
 0x269   :  { %1720 = vmatpush.msrb.mxu2 %v2721_v30  ;;  %v2738_v30 = vld [vmem:[%s4191_s7 + $0x180] sm:$0xff] }
 0x26a   :  { %2602 = vmatmul.msk.f32.gmra.mxu3 %vm351_vm4, %v945_v20  ;;  %v1086_v33 = vpop.f32.mrf.mxu1 }
 0x26b   :  { %2629 = vmatmul.msk.f32.gmra.mxu2 %vm351_vm4, %v1086_v33 }
 0x26c   :  { %v1221_v60 = vpop.f32.mrf.mxu0 }
 0x26d   :  { %v458_v35 = vpop.f32.mrf.mxu3 }
 0x26e   :  { %v459_v36 = vadd.f32 %v458_v35, %v399_v1  ;;  %v592_v37 = vpop.f32.mrf.mxu2  ;;  %v2683_v35 = vld [vmem:[%s4191_s7 + $0x28] sm:$0xff] }
 0x270   :  { %v604_v38 = vadd.f32 %v589_v31, %v459_v36  ;;  %v1464_v36 = vld [vmem:[%s4191_s7 + $0x8] sm:$0xff] }
 0x271   :  { %1513 = vmatpush.msrb.mxu3 %v1464_v36 }
 0x272   :  { %2603 = vmatmul.msk.f32.gmra.mxu3 %vm351_vm4, %v948_v27  ;;  %v1344_v39 = vpop.f32.mrf.mxu1  ;;  %v2684_v27 = vld [vmem:[%s4191_s7 + $0x30] sm:$0xff] }
 0x273   :  { %2675 = vmatmul.msk.f32.vlgmr.msra.gmra.mxu2 %vm351_vm4, %v1344_v39  ;;  %v2720_v39 = vld [vmem:[%s4191_s7 + $0x110] sm:$0xff] }
 0x274   :  { %v1224_v2 = vpop.f32.mrf.mxu0  ;;  %1721 = vmatpush.msrb.mxu2 %v2720_v39 }
 0x275   :  { %v461_v40 = vpop.f32.mrf.mxu3 }
 0x276   :  { %v595_v42 = vpop.f32.mrf.mxu2  ;;  %v462_v3 = vadd.f32 %v461_v40, %v3625_v4  ;;  %v2685_v4 = vld [vmem:[%s4191_s7 + $0x38] sm:$0xff] }
 0x277   :  { %1488 = vmatpush.msra.mxu0 %v2685_v4 }
 0x278   :  { %v605_v6 = vadd.f32 %v592_v37, %v462_v3 }
 0x279   :  { %1489 = vmatpush.msra.mxu0 %v2684_v27 }
 0x27a   :  { %2649 = vmatmul.msk.f32.vlgmr.msra.gmra.mxu3 %vm351_vm4, %v1206_v34  ;;  %v1347_v43 = vpop.f32.mrf.mxu1  ;;  %v2716_v34 = vld [vmem:[%s4191_s7 + $0xf8] sm:$0xff] }
 0x27b   :  { %2676 = vmatmul.msk.f32.gmra.mxu2 %vm351_vm4, %v1347_v43  ;;  %1690 = vmatpush.msrb.mxu1 %v2716_v34 }
 0x27c   :  { %1490 = vmatpush.msra.mxu0 %v2683_v35 }
 0x27d   :  { %v464_v44 = vpop.f32.mrf.mxu3 }
 0x27e   :  { %v598_v45 = vpop.f32.mrf.mxu2  ;;  %v465_v11 = vadd.f32 %v464_v44, %v3635_v9 }
 0x280   :  { %v606_v14 = vadd.f32 %v595_v42, %v465_v11  ;;  %v2715_v42 = vld [vmem:[%s4191_s7 + $0xf0] sm:$0xff]  ;;  %v2734_v11 = vld [vmem:[%s4191_s7 + $0x168] sm:$0xff] }
 0x281   :  { %1691 = vmatpush.msrb.mxu1 %v2715_v42  ;;  %v2701_v42 = vld [vmem:[%s4191_s7 + $0x98] sm:$0xff] }
 0x282   :  { %2650 = vmatmul.msk.f32.gmra.mxu3 %vm351_vm4, %v1209_v41  ;;  %v1350_v47 = vpop.f32.mrf.mxu1 }
 0x283   :  { %2677 = vmatmul.msk.f32.gmra.mxu2 %vm351_vm4, %v1350_v47 }
 0x285   :  { %v467_v48 = vpop.f32.mrf.mxu3 }
 0x286   :  { %v3667_v49 = vpop.f32.mrf.mxu2  ;;  %v468_v19 = vadd.f32 %v467_v48, %v3642_v12 }
 0x288   :  { %v607_v9 = vadd.f32 %v598_v45, %v468_v19  ;;  %v2682_v45 = vld [vmem:[%s4191_s7 + $0x20] sm:$0xff] }
 0x289   :  { %1491 = vmatpush.msra.mxu0 %v2682_v45 }
 0x28a   :  { %2651 = vmatmul.msk.f32.gmra.mxu3 %vm351_vm4, %v1212_v46  ;;  %v1353_v51 = vpop.f32.mrf.mxu1  ;;  %v1463_v46 = vld [vmem:[%s4191_s7] sm:$0xff] }
 0x28b   :  { %2678 = vmatmul.msk.f32.gmra.mxu2 %vm351_vm4, %v1353_v51  ;;  %1514 = vmatpush.msrb.mxu3 %v1463_v46  ;;  %v2714_v51 = vld [vmem:[%s4191_s7 + $0xe8] sm:$0xff] }
 0x28c   :  { %1692 = vmatpush.msrb.mxu1 %v2714_v51  ;;  %v2705_v51 = vld [vmem:[%s4191_s7 + $0xb0] sm:$0xff] }
 0x28d   :  { %v3671_v52 = vpop.f32.mrf.mxu3 }
 0x28e   :  { %v3673_v53 = vpop.f32.mrf.mxu2 }
 0x292   :  { %2652 = vmatmul.msk.f32.gmra.mxu3 %vm351_vm4, %v1215_v50  ;;  %v1356_v54 = vpop.f32.mrf.mxu1  ;;  %v2719_v50 = vld [vmem:[%s4191_s7 + $0x108] sm:$0xff] }
 0x293   :  { %2679 = vmatmul.msk.f32.gmra.mxu2 %vm351_vm4, %v1356_v54  ;;  %v2691_v54 = vld [vmem:[%s4191_s7 + $0x58] sm:$0xff] }
 0x294   :  { %1722 = vmatpush.msrb.mxu2 %v2719_v50  ;;  %1540 = vmatpush.msrb.mxu0 %v2691_v54 }
 0x295   :  { %v3677_v56 = vpop.f32.mrf.mxu3 }
 0x296   :  { %v3679_v57 = vpop.f32.mrf.mxu2 }
 0x29a   :  { %2653 = vmatmul.msk.f32.gmra.mxu3 %vm351_vm4, %v1218_v55  ;;  %v1359_v58 = vpop.f32.mrf.mxu1  ;;  %v2696_v55 = vld [vmem:[%s4191_s7 + $0x78] sm:$0xff] }
 0x29b   :  { %2680 = vmatmul.msk.f32.gmra.mxu2 %vm351_vm4, %v1359_v58  ;;  %1570 = vmatpush.msra.mxu3 %v2696_v55  ;;  %v2690_v58 = vld [vmem:[%s4191_s7 + $0x50] sm:$0xff] }
 0x29c   :  { %1541 = vmatpush.msrb.mxu0 %v2690_v58 }
 0x29d   :  { %v3683_v59 = vpop.f32.mrf.mxu3 }
 0x29e   :  { %v865_v61 = vpop.f32.mrf.mxu2 }
 0x2a2   :  { %2654 = vmatmul.msk.f32.gmra.mxu3 %vm351_vm4, %v1221_v60  ;;  %v1362_v62 = vpop.f32.mrf.mxu1  ;;  %v2695_v60 = vld [vmem:[%s4191_s7 + $0x70] sm:$0xff] }
 0x2a3   :  { %2681 = vmatmul.msk.f32.gmra.mxu2 %vm351_vm4, %v1362_v62  ;;  %1571 = vmatpush.msra.mxu3 %v2695_v60  ;;  %v2689_v62 = vld [vmem:[%s4191_s7 + $0x48] sm:$0xff] }
 0x2a4   :  { %1542 = vmatpush.msrb.mxu0 %v2689_v62  ;;  %v2699_v60 = vld [vmem:[%s4191_s7 + $0x88] sm:$0xff] }
 0x2a5   :  { %v727_v63 = vpop.f32.mrf.mxu3 }
 0x2a6   :  { %v742_v0 = vadd.f32 %v727_v63, %v604_v38  ;;  %v868_v1 = vpop.f32.mrf.mxu2  ;;  %v2694_v63 = vld [vmem:[%s4191_s7 + $0x68] sm:$0xff] }
 0x2a7   :  { %1572 = vmatpush.msra.mxu3 %v2694_v63  ;;  %v2698_v63 = vld [vmem:[%s4191_s7 + $0x80] sm:$0xff] }
 0x2a8   :  { %v3688_v5 = vadd.f32 %v865_v61, %v742_v0  ;;  %v739_v61 = vadd.f32 %v3671_v52, %v3649_v21  ;;  %v2688_v0 = vld [vmem:[%s4191_s7 + $0x40] sm:$0xff] }
 0x2a9   :  { %v2693_v21 = vld [vmem:[%s4191_s7 + $0x60] sm:$0xff]  ;;  %1543 = vmatpush.msrb.mxu0 %v2688_v0 }
 0x2aa   :  { %2655 = vmatmul.msk.f32.gmra.mxu3 %vm351_vm4, %v1224_v2  ;;  %v2713_v52 = vld [vmem:[%s4191_s7 + $0xe0] sm:$0xff]  ;;  %v877_v2 = vadd.f32 %v3667_v49, %v739_v61  ;;  %v740_v49 = vadd.f32 %v3677_v56, %v3653_v26  ;;  %v2704_v61 = vld [vmem:[%s4191_s7 + $0xa8] sm:$0xff] }
 0x2ab   :  { %1693 = vmatpush.msrb.mxu1 %v2713_v52  ;;  %1573 = vmatpush.msra.mxu3 %v2693_v21  ;;  %v3819_v26 = vld [vmem:[%s4221_s30] ss:$0 sm:$0xff]  ;;  %v2711_v21 = vld [vmem:[%s4191_s7 + $0xd8] sm:$0xff]  ;;  %s2431_s30 = sshll.u32 %s4205_s21, 4  ;;  %s2432_s30 = int_to_ptr.hbm [resolvable:$true] %s2431_s30 }
 0x2ac   :  { %v2726_v52 = vld [vmem:[%s4191_s7 + $0x138] sm:$0xff] }
 0x2ad   :  { %v730_v7 = vpop.f32.mrf.mxu3 }
 0x2ae   :  { %v743_v8 = vadd.f32 %v730_v7, %v605_v6  ;;  %v871_v10 = vpop.f32.mrf.mxu2  ;;  %v2718_v6 = vld [vmem:[%s4191_s7 + $0x100] sm:$0xff]  ;;  %v2736_v7 = vld [vmem:[%s4191_s7 + $0x178] sm:$0xff] }
 0x2af   :  { %1723 = vmatpush.msrb.mxu2 %v2718_v6  ;;  %1810 = vmatpush.msra.mxu1 %v2736_v7 }
 0x2b0   :  { %v3692_v13 = vadd.f32 %v868_v1, %v743_v8 }
 0x2b1   :  { %1840 = vmatpush.msra.mxu2 %v2741_v18 }
 0x2b5   :  { %v733_v15 = vpop.f32.mrf.mxu3 }
 0x2b6   :  { %v744_v16 = vadd.f32 %v733_v15, %v606_v14  ;;  %v874_v17 = vpop.f32.mrf.mxu2 }
 0x2b8   :  { %v3701_v20 = vadd.f32 %v871_v10, %v744_v16  ;;  %v2735_v10 = vld [vmem:[%s4191_s7 + $0x170] sm:$0xff]  ;;  %v2733_v16 = vld [vmem:[%s4191_s7 + $0x160] sm:$0xff] }
 0x2b9   :  { %1811 = vmatpush.msra.mxu1 %v2735_v10  ;;  %v2710_v10 = vld [vmem:[%s4191_s7 + $0xd0] sm:$0xff] }
 0x2bb   :  { %1812 = vmatpush.msra.mxu1 %v2734_v11  ;;  %v2755_v11 = vld [vmem:[%s4191_s7 + $0x1f0] sm:$0xff] }
 0x2bd   :  { %v736_v22 = vpop.f32.mrf.mxu3  ;;  %1813 = vmatpush.msra.mxu1 %v2733_v16  ;;  %v2709_v16 = vld [vmem:[%s4191_s7 + $0xc8] sm:$0xff] }
 0x2be   :  { %v745_v23 = vadd.f32 %v736_v22, %v607_v9  ;;  %v3703_v24 = vpop.f32.mrf.mxu2  ;;  %v741_v22 = vadd.f32 %v3683_v59, %v3657_v32 }
 0x2c0   :  { %v3705_v25 = vadd.f32 %v874_v17, %v745_v23  ;;  %v878_v17 = vadd.f32 %v3673_v53, %v740_v49  ;;  %v2740_v53 = vld [vmem:[%s4191_s7 + $0x190] sm:$0xff] }
 0x2c1   :  { %1841 = vmatpush.msra.mxu2 %v2740_v53  ;;  %v2725_v49 = vld [vmem:[%s4191_s7 + $0x130] sm:$0xff]  ;;  %v2723_v53 = vld [vmem:[%s4191_s7 + $0x120] sm:$0xff] }
 0x2c5   :  { %v994_v12 = vpop.f32.mrf.mxu3 }
 0x2c6   :  { %v3713_v29 = vpop.f32.mrf.mxu2  ;;  %v1015_v8 = vadd.f32 %v994_v12, %v877_v2  ;;  %v2756_v2 = vld [vmem:[%s4191_s7 + $0x1f8] sm:$0xff] }
 0x2c8   :  { %v1153_v14 = vadd.f32 %v3703_v24, %v1015_v8  ;;  %v2739_v24 = vld [vmem:[%s4191_s7 + $0x188] sm:$0xff] }
 0x2c9   :  { %1842 = vmatpush.msra.mxu2 %v2739_v24 }
 0x2cb   :  { %1843 = vmatpush.msra.mxu2 %v2738_v30  ;;  %v2746_v30 = vld [vmem:[%s4191_s7 + $0x1b8] sm:$0xff] }
 0x2cd   :  { %v3718_v31 = vpop.f32.mrf.mxu3 }
 0x2ce   :  { %v3720_v33 = vpop.f32.mrf.mxu2  ;;  %v1016_v19 = vadd.f32 %v3718_v31, %v878_v17  ;;  %v879_v31 = vadd.f32 %v3679_v57, %v741_v22  ;;  %v2706_v57 = vld [vmem:[%s4191_s7 + $0xb8] sm:$0xff]  ;;  %v2753_v22 = vld [vmem:[%s4191_s7 + $0x1e0] sm:$0xff] }
 0x2d0   :  { %v1154_v27 = vadd.f32 %v3713_v29, %v1016_v19 }
 0x2d5   :  { %v3731_v37 = vpop.f32.mrf.mxu3 }
 0x2d6   :  { %v3733_v38 = vpop.f32.mrf.mxu2  ;;  %v1017_v34 = vadd.f32 %v3731_v37, %v879_v31  ;;  %v2761_v31 = vld [vmem:[%s4191_s7 + $0x218] sm:$0xff] }
 0x2d8   :  { %v1155_v29 = vadd.f32 %v3720_v33, %v1017_v34  ;;  %v2700_v33 = vld [vmem:[%s4191_s7 + $0x90] sm:$0xff] }
 0x2dd   :  { %v3738_v40 = vpop.f32.mrf.mxu3 }
 0x2de   :  { %v3740_v41 = vpop.f32.mrf.mxu2  ;;  %v1018_v55 = vadd.f32 %v3738_v40, %v3688_v5  ;;  %v2703_v5 = vld [vmem:[%s4191_s7 + $0xa0] sm:$0xff] }
 0x2e0   :  { %v1156_v40 = vadd.f32 %v3733_v38, %v1018_v55 }
 0x2e5   :  { %v3745_v43 = vpop.f32.mrf.mxu3 }
 0x2e6   :  { %v3747_v44 = vpop.f32.mrf.mxu2 }
 0x2ed   :  { %v3755_v47 = vpop.f32.mrf.mxu3 }
 0x2ee   :  { %v3757_v48 = vpop.f32.mrf.mxu2 }
 0x2f5   :  { %v3794_v1 = vpop.f32.mrf.mxu3 }
 0x2f6   :  { %v1408_v3 = vpop.f32.mrf.mxu2 }
 0x2fd   :  { %v1270_v15 = vpop.f32.mrf.mxu3 }
 0x2fe   :  { %v1291_v4 = vadd.f32 %v1270_v15, %v1153_v14  ;;  %v1411_v56 = vpop.f32.mrf.mxu2  ;;  %v1019_v14 = vadd.f32 %v3745_v43, %v3692_v13  ;;  %v2708_v13 = vld [vmem:[%s4191_s7 + $0xc0] sm:$0xff] }
 0x300   :  { %v1429_v9 = vadd.f32 %v1408_v3, %v1291_v4  ;;  %v2724_v4 = vld [vmem:[%s4191_s7 + $0x128] sm:$0xff]  ;;  %v1157_v43 = vadd.f32 %v3740_v41, %v1019_v14 }
 0x302   :  { %v1440_v23 = vadd.f32 %v3819_v26, %v1429_v9 }
 0x304   :  { %v1447_v28 = vmax.f32 %v1440_v23, 0.0 }
 0x305   :  { %v1273_v12 = vpop.f32.mrf.mxu3 }
 0x306   :  { %1454 = vst.msk [vmem:[#allocation2] sm:$0xff] %vm351_vm4, %v1447_v28  ;;  %v1292_v32 = vadd.f32 %v1273_v12, %v1154_v27  ;;  %v1414_v59 = vpop.f32.mrf.mxu2  ;;  %v2731_v12 = vld [vmem:[%s4191_s7 + $0x158] sm:$0xff] }
 0x308   :  { %v1430_v35 = vadd.f32 %v1411_v56, %v1292_v32  ;;  %v2754_v56 = vld [vmem:[%s4191_s7 + $0x1e8] sm:$0xff]  ;;  %v2776_v32 = vld [vmem:[%s4191_s7 + $0x278] sm:$0xff] }
 0x30a   :  { %v1441_v36 = vadd.f32 %v3819_v26, %v1430_v35  ;;  %v2730_v35 = vld [vmem:[%s4191_s7 + $0x150] sm:$0xff] }
 0x30c   :  { %v1448_v39 = vmax.f32 %v1441_v36, 0.0  ;;  %v2745_v36 = vld [vmem:[%s4191_s7 + $0x1b0] sm:$0xff] }
 0x30d   :  { %v1276_v45 = vpop.f32.mrf.mxu3  ;;  %v1467_v46 = vld [vmem:[#allocation2 + $0x2] sm:$0x3]  ;;  %v1462_v50 = vld [vmem:[#allocation2] sm:$0x3]  ;;  %v1519_v6 = vld [vmem:[#allocation2 + $0x4] sm:$0x3] }
 0x30e   :  { %1455 = vst.msk [vmem:[#allocation2 + $0x8] sm:$0xff] %vm351_vm4, %v1448_v39  ;;  %v1293_v37 = vadd.f32 %v1276_v45, %v1155_v29  ;;  %2686 = vmatmul.msk.f32.vlgmr.msra.gmra.mxu0 %vm351_vm4, %v1467_v46  ;;  %2687 = vmatmul.msk.f32.vlgmr.msrb.gmra.mxu3 %vm351_vm4, %v1462_v50  ;;  %v1417_v54 = vpop.f32.mrf.mxu2  ;;  %v1549_v7 = vld [vmem:[#allocation2 + $0x6] sm:$0x3]  ;;  %v2760_v29 = vld [vmem:[%s4191_s7 + $0x210] sm:$0xff]  ;;  %v2729_v39 = vld [vmem:[%s4191_s7 + $0x148] sm:$0xff] }
 0x30f   :  { %1600 = vmatpush.msra.mxu0 %v2701_v42  ;;  %1630 = vmatpush.msrb.mxu3 %v2706_v57  ;;  %v2744_v42 = vld [vmem:[%s4191_s7 + $0x1a8] sm:$0xff] }
 0x310   :  { %v1431_v58 = vadd.f32 %v1414_v59, %v1293_v37  ;;  %v1020_v59 = vadd.f32 %v3755_v47, %v3701_v20  ;;  %v2775_v20 = vld [vmem:[%s4191_s7 + $0x270] sm:$0xff]  ;;  %v2759_v37 = vld [vmem:[%s4191_s7 + $0x208] sm:$0xff] }
 0x311   :  { %1601 = vmatpush.msra.mxu0 %v2700_v33  ;;  %1631 = vmatpush.msrb.mxu3 %v2705_v51  ;;  %v2774_v33 = vld [vmem:[%s4191_s7 + $0x268] sm:$0xff] }
 0x312   :  { %v1442_v62 = vadd.f32 %v3819_v26, %v1431_v58  ;;  %v1158_v45 = vadd.f32 %v3747_v44, %v1020_v59  ;;  %v2800_v59 = vld [vmem:[%s4191_s7 + $0x310] sm:$0xff] }
 0x313   :  { %1602 = vmatpush.msra.mxu0 %v2699_v60  ;;  %1632 = vmatpush.msrb.mxu3 %v2704_v61  ;;  %v2728_v60 = vld [vmem:[%s4191_s7 + $0x140] sm:$0xff] }
 0x314   :  { %v1449_v0 = vmax.f32 %v1442_v62, 0.0  ;;  %v2743_v61 = vld [vmem:[%s4191_s7 + $0x1a0] sm:$0xff] }
 0x315   :  { %v1279_v3 = vpop.f32.mrf.mxu3  ;;  %v1669_v8 = vld [vmem:[#allocation2 + $0xe] sm:$0x3]  ;;  %1603 = vmatpush.msra.mxu0 %v2698_v63  ;;  %1633 = vmatpush.msrb.mxu3 %v2703_v5  ;;  %v1579_v9 = vld [vmem:[#allocation2 + $0x8] sm:$0x3]  ;;  %v1609_v24 = vld [vmem:[#allocation2 + $0xa] sm:$0x3]  ;;  %v1021_v5 = vadd.f32 %v3794_v1, %v3705_v25 }
 0x316   :  { %1456 = vst.msk [vmem:[#allocation2 + $0x10] sm:$0xff] %vm351_vm4, %v1449_v0  ;;  %v1294_v38 = vadd.f32 %v1279_v3, %v1156_v40  ;;  %2692 = vmatmul.msk.f32.vlgmr.msrb.gmra.mxu0 %vm351_vm4, %v1519_v6  ;;  %2697 = vmatmul.msk.f32.vlgmr.msra.gmra.mxu3 %vm351_vm4, %v1549_v7  ;;  %v1420_v17 = vpop.f32.mrf.mxu2  ;;  %v1639_v50 = vld [vmem:[#allocation2 + $0xc] sm:$0x3]  ;;  %v2758_v62 = vld [vmem:[%s4191_s7 + $0x200] sm:$0xff]  ;;  %v2751_v0 = vld [vmem:[%s4191_s7 + $0x1d8] sm:$0xff] }
 0x317   :  { %2717 = vmatmul.msk.f32.vlgmr.msrb.gmra.mxu1 %vm351_vm4, %v1669_v8  ;;  %1660 = vmatpush.msrb.mxu0 %v2711_v21  ;;  %v2773_v63 = vld [vmem:[%s4191_s7 + $0x260] sm:$0xff]  ;;  %v2766_v21 = vld [vmem:[%s4191_s7 + $0x238] sm:$0xff]  ;;  %v2765_v3 = vld [vmem:[%s4191_s7 + $0x230] sm:$0xff]  ;;  %v1159_v6 = vadd.f32 %v3757_v48, %v1021_v5 }
 0x318   :  { %v1432_v15 = vadd.f32 %v1417_v54, %v1294_v38  ;;  %1750 = vmatpush.msra.mxu3 %v2726_v52  ;;  %1930 = vmatpush.msrb.mxu1 %v2756_v2  ;;  %v2781_v52 = vld [vmem:[%s4191_s7 + $0x298] sm:$0xff]  ;;  %v2750_v2 = vld [vmem:[%s4191_s7 + $0x1d0] sm:$0xff] }
 0x319   :  { %1661 = vmatpush.msrb.mxu0 %v2710_v10  ;;  %v2796_v25 = vld [vmem:[%s4191_s7 + $0x2f8] sm:$0xff]  ;;  %v2780_v38 = vld [vmem:[%s4191_s7 + $0x290] sm:$0xff] }
 0x31a   :  { %v1443_v18 = vadd.f32 %v3819_v26, %v1432_v15  ;;  %1751 = vmatpush.msra.mxu3 %v2725_v49  ;;  %1931 = vmatpush.msrb.mxu1 %v2755_v11  ;;  %v2795_v10 = vld [vmem:[%s4191_s7 + $0x2f0] sm:$0xff] }
 0x31b   :  { %1662 = vmatpush.msrb.mxu0 %v2709_v16 }
 0x31c   :  { %v1450_v19 = vmax.f32 %v1443_v18, 0.0  ;;  %1752 = vmatpush.msra.mxu3 %v2724_v4  ;;  %1932 = vmatpush.msrb.mxu1 %v2754_v56  ;;  %v2764_v4 = vld [vmem:[%s4191_s7 + $0x228] sm:$0xff] }
 0x31d   :  { %v1282_v23 = vpop.f32.mrf.mxu3  ;;  %v1699_v27 = vld [vmem:[#allocation2 + $0x10] sm:$0x3]  ;;  %v1789_v28 = vld [vmem:[#allocation2 + $0x16] sm:$0x3]  ;;  %1663 = vmatpush.msrb.mxu0 %v2708_v13  ;;  %v1729_v54 = vld [vmem:[#allocation2 + $0x12] sm:$0x3] }
 0x31e   :  { %1457 = vst.msk [vmem:[#allocation2 + $0x18] sm:$0xff] %vm351_vm4, %v1450_v19  ;;  %v1295_v41 = vadd.f32 %v1282_v23, %v1157_v43  ;;  %2702 = vmatmul.msk.f32.vlgmr.msra.gmra.mxu0 %vm351_vm4, %v1579_v9  ;;  %2707 = vmatmul.msk.f32.vlgmr.msrb.gmra.mxu3 %vm351_vm4, %v1609_v24  ;;  %v1423_v57 = vpop.f32.mrf.mxu2  ;;  %v1759_v8 = vld [vmem:[#allocation2 + $0x14] sm:$0x3]  ;;  %v2779_v56 = vld [vmem:[%s4191_s7 + $0x288] sm:$0xff]  ;;  %v2748_v43 = vld [vmem:[%s4191_s7 + $0x1c0] sm:$0xff] }
 0x31f   :  { %2722 = vmatmul.msk.f32.vlgmr.msrb.gmra.mxu2 %vm351_vm4, %v1699_v27  ;;  %2737 = vmatmul.msk.f32.vlgmr.msra.gmra.mxu1 %vm351_vm4, %v1789_v28  ;;  %v2794_v18 = vld [vmem:[%s4191_s7 + $0x2e8] sm:$0xff]  ;;  %v2763_v19 = vld [vmem:[%s4191_s7 + $0x220] sm:$0xff]  ;;  %v2771_v23 = vld [vmem:[%s4191_s7 + $0x258] sm:$0xff] }
 0x320   :  { %v1433_v34 = vadd.f32 %v1420_v17, %v1295_v41  ;;  %1753 = vmatpush.msra.mxu3 %v2723_v53  ;;  %1933 = vmatpush.msrb.mxu1 %v2753_v22  ;;  %v2749_v17 = vld [vmem:[%s4191_s7 + $0x1c8] sm:$0xff]  ;;  %v2778_v9 = vld [vmem:[%s4191_s7 + $0x280] sm:$0xff]  ;;  %v2786_v24 = vld [vmem:[%s4191_s7 + $0x2b8] sm:$0xff] }
 0x321   :  { %1780 = vmatpush.msra.mxu0 %v2731_v12  ;;  %1960 = vmatpush.msrb.mxu2 %v2761_v31  ;;  %v2793_v53 = vld [vmem:[%s4191_s7 + $0x2e0] sm:$0xff]  ;;  %v2770_v41 = vld [vmem:[%s4191_s7 + $0x250] sm:$0xff] }
 0x322   :  { %1870 = vmatpush.msrb.mxu3 %v2746_v30  ;;  %v1444_v47 = vadd.f32 %v3819_v26, %v1433_v34  ;;  %2050 = vmatpush.msra.mxu1 %v2776_v32  ;;  %v2785_v32 = vld [vmem:[%s4191_s7 + $0x2b0] sm:$0xff]  ;;  %v2769_v34 = vld [vmem:[%s4191_s7 + $0x248] sm:$0xff] }
 0x323   :  { %1781 = vmatpush.msra.mxu0 %v2730_v35  ;;  %1961 = vmatpush.msrb.mxu2 %v2760_v29  ;;  %v2784_v35 = vld [vmem:[%s4191_s7 + $0x2a8] sm:$0xff]  ;;  %v2768_v29 = vld [vmem:[%s4191_s7 + $0x240] sm:$0xff] }
 0x324   :  { %1871 = vmatpush.msrb.mxu3 %v2745_v36  ;;  %v1451_v46 = vmax.f32 %v1444_v47, 0.0  ;;  %2051 = vmatpush.msra.mxu1 %v2775_v20  ;;  %v2799_v36 = vld [vmem:[%s4191_s7 + $0x308] sm:$0xff]  ;;  %v2783_v20 = vld [vmem:[%s4191_s7 + $0x2a0] sm:$0xff]  ;;  %v2791_v47 = vld [vmem:[%s4191_s7 + $0x2d8] sm:$0xff] }
 0x325   :  { %v1285_v51 = vpop.f32.mrf.mxu3  ;;  %v1819_v55 = vld [vmem:[#allocation2 + $0x18] sm:$0x3]  ;;  %v1909_v58 = vld [vmem:[#allocation2 + $0x1e] sm:$0x3]  ;;  %1782 = vmatpush.msra.mxu0 %v2729_v39  ;;  %1962 = vmatpush.msrb.mxu2 %v2759_v37  ;;  %v1849_v11 = vld [vmem:[#allocation2 + $0x1a] sm:$0x3] }
 0x326   :  { %1872 = vmatpush.msrb.mxu3 %v2744_v42  ;;  %1458 = vst.msk [vmem:[#allocation2 + $0x20] sm:$0xff] %vm351_vm4, %v1451_v46  ;;  %v1296_v44 = vadd.f32 %v1285_v51, %v1158_v45  ;;  %2712 = vmatmul.msk.f32.vlgmr.msrb.gmra.mxu0 %vm351_vm4, %v1639_v50  ;;  %v1426_v16 = vpop.f32.mrf.mxu2  ;;  %v1879_v28 = vld [vmem:[#allocation2 + $0x1c] sm:$0x3]  ;;  %v2798_v39 = vld [vmem:[%s4191_s7 + $0x300] sm:$0xff]  ;;  %v2790_v45 = vld [vmem:[%s4191_s7 + $0x2d0] sm:$0xff] }
 0x327   :  { %2727 = vmatmul.msk.f32.vlgmr.msra.gmra.mxu3 %vm351_vm4, %v1729_v54  ;;  %2742 = vmatmul.msk.f32.vlgmr.msra.gmra.mxu2 %vm351_vm4, %v1819_v55  ;;  %v2789_v50 = vld [vmem:[%s4191_s7 + $0x2c8] sm:$0xff]  ;;  %v2788_v37 = vld [vmem:[%s4191_s7 + $0x2c0] sm:$0xff] }
 0x328   :  { %2757 = vmatmul.msk.f32.vlgmr.msrb.gmra.mxu1 %vm351_vm4, %v1909_v58  ;;  %v1434_v40 = vadd.f32 %v1423_v57, %v1296_v44  ;;  %1783 = vmatpush.msra.mxu0 %v2728_v60 }
 0x329   :  { %2052 = vmatpush.msra.mxu1 %v2774_v33  ;;  %1873 = vmatpush.msrb.mxu3 %v2743_v61 }
 0x32a   :  { %v1445_v1 = vadd.f32 %v3819_v26, %v1434_v40  ;;  %1963 = vmatpush.msrb.mxu2 %v2758_v62  ;;  %1900 = vmatpush.msrb.mxu0 %v2751_v0 }
 0x32b   :  { %2053 = vmatpush.msra.mxu1 %v2773_v63  ;;  %1990 = vmatpush.msra.mxu3 %v2766_v21 }
 0x32c   :  { %v1452_v7 = vmax.f32 %v1445_v1, 0.0  ;;  %2080 = vmatpush.msra.mxu2 %v2781_v52  ;;  %1901 = vmatpush.msrb.mxu0 %v2750_v2 }
 0x32d   :  { %2170 = vmatpush.msrb.mxu1 %v2796_v25  ;;  %v1288_v49 = vpop.f32.mrf.mxu3  ;;  %v1939_v14 = vld [vmem:[#allocation2 + $0x20] sm:$0x3]  ;;  %v2029_v15 = vld [vmem:[#allocation2 + $0x26] sm:$0x3]  ;;  %1991 = vmatpush.msra.mxu3 %v2765_v3  ;;  %v1969_v12 = vld [vmem:[#allocation2 + $0x22] sm:$0x3] }
 0x32e   :  { %1459 = vst.msk [vmem:[#allocation2 + $0x28] sm:$0xff] %vm351_vm4, %v1452_v7  ;;  %v1297_v48 = vadd.f32 %v1288_v49, %v1159_v6  ;;  %2732 = vmatmul.msk.f32.vlgmr.msra.gmra.mxu0 %vm351_vm4, %v1759_v8  ;;  %2081 = vmatpush.msra.mxu2 %v2780_v38  ;;  %v1999_v42 = vld [vmem:[#allocation2 + $0x24] sm:$0x3] }
 0x32f   :  { %2747 = vmatmul.msk.f32.vlgmr.msrb.gmra.mxu3 %vm351_vm4, %v1849_v11  ;;  %2762 = vmatmul.msk.f32.vlgmr.msrb.gmra.mxu2 %vm351_vm4, %v1939_v14 }
 0x330   :  { %2777 = vmatmul.msk.f32.vlgmr.msra.gmra.mxu1 %vm351_vm4, %v2029_v15  ;;  %v1435_v13 = vadd.f32 %v1426_v16, %v1297_v48  ;;  %1902 = vmatpush.msrb.mxu0 %v2749_v17 }
 0x331   :  { %2171 = vmatpush.msrb.mxu1 %v2795_v10  ;;  %1992 = vmatpush.msra.mxu3 %v2764_v4 }
 0x332   :  { %v1446_v22 = vadd.f32 %v3819_v26, %v1435_v13  ;;  %2082 = vmatpush.msra.mxu2 %v2779_v56  ;;  %1903 = vmatpush.msrb.mxu0 %v2748_v43  ;;  %v2801_v26 = vld [vmem:[%s4191_s7 + $0x318] sm:$0xff] }
 0x333   :  { %2172 = vmatpush.msrb.mxu1 %v2794_v18  ;;  %1993 = vmatpush.msra.mxu3 %v2763_v19 }
 0x334   :  { %v1453_v27 = vmax.f32 %v1446_v22, 0.0  ;;  %2083 = vmatpush.msra.mxu2 %v2778_v9  ;;  %2020 = vmatpush.msra.mxu0 %v2771_v23 }
 0x335   :  { %2173 = vmatpush.msrb.mxu1 %v2793_v53  ;;  %v2059_v30 = vld [vmem:[#allocation2 + $0x28] sm:$0x3]  ;;  %2110 = vmatpush.msrb.mxu3 %v2786_v24  ;;  %v2149_v31 = vld [vmem:[#allocation2 + $0x2e] sm:$0x3]  ;;  %v2089_v46 = vld [vmem:[#allocation2 + $0x2a] sm:$0x3] }
 0x336   :  { %1461 = vst.msk [vmem:[#allocation2 + $0x30] sm:$0x3] %vm1460_vm5, %v1453_v27  ;;  %2752 = vmatmul.msk.f32.vlgmr.msrb.gmra.mxu0 %vm351_vm4, %v1879_v28  ;;  %2200 = vmatpush.msrb.mxu2 %v2801_v26  ;;  %v2119_v33 = vld [vmem:[#allocation2 + $0x2c] sm:$0x3] }
 0x337   :  { %2767 = vmatmul.msk.f32.vlgmr.msra.gmra.mxu3 %vm351_vm4, %v1969_v12  ;;  %2782 = vmatmul.msk.f32.vlgmr.msra.gmra.mxu2 %vm351_vm4, %v2059_v30 }
 0x338   :  { %2797 = vmatmul.msk.f32.vlgmr.msrb.gmra.mxu1 %vm351_vm4, %v2149_v31  ;;  %2021 = vmatpush.msra.mxu0 %v2770_v41  ;;  %v2813_v31 = vld [vmem:[%s4192_s8] ss:$0 sm:$0xff] }
 0x339   :  { %2111 = vmatpush.msrb.mxu3 %v2785_v32  ;;  %2201 = vmatpush.msrb.mxu2 %v2800_v59 }
 0x33a   :  { %2022 = vmatpush.msra.mxu0 %v2769_v34 }
 0x33b   :  { %2112 = vmatpush.msrb.mxu3 %v2784_v35  ;;  %2202 = vmatpush.msrb.mxu2 %v2799_v36  ;;  %v2882_v36 = vmov 32.0  }
 0x33c   :  { %2023 = vmatpush.msra.mxu0 %v2768_v29  ;;  %2820 = vrcp.f32 %v2882_v36 }
 0x33d   :  { %2113 = vmatpush.msrb.mxu3 %v2783_v20  ;;  %v2179_v57 = vld [vmem:[#allocation2 + $0x30] sm:$0x3]  ;;  %2203 = vmatpush.msrb.mxu2 %v2798_v39 }
 0x33e   :  { %2140 = vmatpush.msrb.mxu0 %v2791_v47 }
 0x33f   :  { %2772 = vmatmul.msk.f32.vlgmr.msra.gmra.mxu0 %vm351_vm4, %v1999_v42  ;;  %2787 = vmatmul.msk.f32.vlgmr.msrb.gmra.mxu3 %vm351_vm4, %v2089_v46 }
 0x340   :  { %2802 = vmatmul.msk.f32.vlgmr.msrb.gmra.mxu2 %vm351_vm4, %v2179_v57  ;;  %2141 = vmatpush.msrb.mxu0 %v2790_v45 }
 0x342   :  { %2142 = vmatpush.msrb.mxu0 %v2789_v50  ;;  %v2821_v29 = vpop.eup %2820 }
 0x343   :  { %v2218_v20 = vmul.f32 32.0, %v2821_v29  ;;  %vm2222_vm6 = vweird.f32 %v2821_v29 }
 0x344   :  { %2143 = vmatpush.msrb.mxu0 %v2788_v37 }
 0x345   :  { %v2219_v47 = vsub.f32 1.0, %v2218_v20 }
 0x347   :  { %2792 = vmatmul.msk.f32.vlgmr.msrb.gmra.mxu0 %vm351_vm4, %v2119_v33  ;;  %v2220_v39 = vmul.f32 %v2821_v29, %v2219_v47 }
 0x349   :  { %v2221_v42 = vadd.f32 %v2821_v29, %v2220_v39 }
 0x34b   :  { %v2223_v57 = vsel %vm2222_vm6, %v2821_v29, %v2221_v42 }
 0x38b   :  { %v1493_v51 = vpop.f32.mrf.mxu0 }
 0x391   :  { %v1516_v54 = vpop.f32.mrf.mxu3 }
 0x392   :  { %v1517_v58 = vadd.f32 %v1516_v54, %v1493_v51  ;;  %v2259_v51 = vld [vmem:[%s4196_s12] sm:$0xff]  ;;  %v2257_v54 = vld [vmem:[%s4195_s11 + $0x18] sm:$0xff] }
 0x393   :  { %v1545_v55 = vpop.f32.mrf.mxu0  ;;  %2279 = vmatpush.msra.mxu3 %v2259_v51  ;;  %2299 = vmatpush.msra.mxu0 %v2257_v54 }
 0x394   :  { %v1548_v60 = vadd.f32 %v1545_v55, %v1517_v58  ;;  %v1695_v63 = vpop.f32.mrf.mxu1  ;;  %v2258_v55 = vld [vmem:[%s4190_s6] sm:$0x3]  ;;  %v2256_v58 = vld [vmem:[%s4195_s11 + $0x10] sm:$0xff] }
 0x395   :  { %2803 = vmatmul.msk.f32.vlgmr.msra.gmra.mxu3 %vm2260_vm7, %v2258_v55  ;;  %2300 = vmatpush.msra.mxu0 %v2256_v58 }
 0x399   :  { %v1575_v44 = vpop.f32.mrf.mxu3 }
 0x39a   :  { %v1578_v62 = vadd.f32 %v1575_v44, %v1548_v60  ;;  %v2255_v44 = vld [vmem:[%s4195_s11 + $0x8] sm:$0xff] }
 0x39b   :  { %v1605_v61 = vpop.f32.mrf.mxu0  ;;  %2301 = vmatpush.msra.mxu0 %v2255_v44 }
 0x39c   :  { %v1608_v5 = vadd.f32 %v1605_v61, %v1578_v62  ;;  %v1815_v2 = vpop.f32.mrf.mxu1  ;;  %v2254_v61 = vld [vmem:[%s4195_s11] sm:$0xff] }
 0x39d   :  { %2302 = vmatpush.msra.mxu0 %v2254_v61 }
 0x3a1   :  { %v1635_v40 = vpop.f32.mrf.mxu3 }
 0x3a2   :  { %v1638_v0 = vadd.f32 %v1635_v40, %v1608_v5  ;;  %v1725_v21 = vpop.f32.mrf.mxu2  ;;  %v2316_v5 = vld [vmem:[%s4198_s14 + $0x18] sm:$0xff] }
 0x3a3   :  { %v1665_v52 = vpop.f32.mrf.mxu0  ;;  %2336 = vmatpush.msra.mxu1 %v2316_v5 }
 0x3a4   :  { %v1668_v25 = vadd.f32 %v1665_v52, %v1638_v0 }
 0x3a5   :  { %v1935_v15 = vpop.f32.mrf.mxu1 }
 0x3a6   :  { %v1698_v1 = vadd.f32 %v1695_v63, %v1668_v25 }
 0x3a8   :  { %v1728_v3 = vadd.f32 %v1725_v21, %v1698_v1 }
 0x3aa   :  { %v1755_v6 = vpop.f32.mrf.mxu3  ;;  %v1845_v8 = vpop.f32.mrf.mxu2 }
 0x3ab   :  { %v1758_v7 = vadd.f32 %v1755_v6, %v1728_v3  ;;  %v1785_v38 = vpop.f32.mrf.mxu0  ;;  %v2815_v6 = vld [vmem:[%s4194_s10] ss:$0 sm:$0xff] }
 0x3ad   :  { %v1788_v10 = vadd.f32 %v1785_v38, %v1758_v7  ;;  %v2055_v9 = vpop.f32.mrf.mxu1 }
 0x3af   :  { %v1818_v49 = vadd.f32 %v1815_v2, %v1788_v10  ;;  %v2814_v2 = vld [vmem:[%s4193_s9] ss:$0 sm:$0xff] }
 0x3b1   :  { %v1848_v11 = vadd.f32 %v1845_v8, %v1818_v49  ;;  %v2315_v49 = vld [vmem:[%s4198_s14 + $0x10] sm:$0xff] }
 0x3b2   :  { %v1875_v14 = vpop.f32.mrf.mxu3  ;;  %v1965_v17 = vpop.f32.mrf.mxu2  ;;  %2337 = vmatpush.msra.mxu1 %v2315_v49 }
 0x3b3   :  { %v1878_v16 = vadd.f32 %v1875_v14, %v1848_v11  ;;  %v1905_v48 = vpop.f32.mrf.mxu0  ;;  %v2314_v11 = vld [vmem:[%s4198_s14 + $0x8] sm:$0xff]  ;;  %v2313_v14 = vld [vmem:[%s4198_s14] sm:$0xff] }
 0x3b4   :  { %2338 = vmatpush.msra.mxu1 %v2314_v11 }
 0x3b5   :  { %v1908_v4 = vadd.f32 %v1905_v48, %v1878_v16  ;;  %v2175_v12 = vpop.f32.mrf.mxu1  ;;  %v2348_v16 = vld [vmem:[%s4200_s16 + $0x18] sm:$0xff]  ;;  %v2378_v48 = vld [vmem:[%s4202_s18 + $0x10] sm:$0xff] }
 0x3b6   :  { %2339 = vmatpush.msra.mxu1 %v2313_v14  ;;  %2368 = vmatpush.msra.mxu2 %v2348_v16 }
 0x3b7   :  { %v1938_v56 = vadd.f32 %v1935_v15, %v1908_v4  ;;  %v2379_v15 = vld [vmem:[%s4202_s18 + $0x18] sm:$0xff]  ;;  %v2816_v4 = vld [vmem:[%s4197_s13] ss:$0 sm:$0xff] }
 0x3b8   :  { %2396 = vmatpush.msrb.mxu3 %v2379_v15 }
 0x3b9   :  { %v1968_v18 = vadd.f32 %v1965_v17, %v1938_v56 }
 0x3ba   :  { %v1995_v13 = vpop.f32.mrf.mxu3  ;;  %v2085_v22 = vpop.f32.mrf.mxu2  ;;  %2397 = vmatpush.msrb.mxu3 %v2378_v48 }
 0x3bb   :  { %v1998_v43 = vadd.f32 %v1995_v13, %v1968_v18 }
 0x3bc   :  { %v2025_v19 = vpop.f32.mrf.mxu0 }
 0x3bd   :  { %v2028_v53 = vadd.f32 %v2025_v19, %v1998_v43  ;;  %v2347_v19 = vld [vmem:[%s4200_s16 + $0x10] sm:$0xff] }
 0x3be   :  { %2369 = vmatpush.msra.mxu2 %v2347_v19 }
 0x3bf   :  { %v2058_v23 = vadd.f32 %v2055_v9, %v2028_v53  ;;  %v2377_v9 = vld [vmem:[%s4202_s18 + $0x8] sm:$0xff] }
 0x3c0   :  { %v2346_v53 = vld [vmem:[%s4200_s16 + $0x8] sm:$0xff]  ;;  %2398 = vmatpush.msrb.mxu3 %v2377_v9 }
 0x3c1   :  { %v2088_v24 = vadd.f32 %v2085_v22, %v2058_v23  ;;  %2370 = vmatpush.msra.mxu2 %v2346_v53  ;;  %v2376_v22 = vld [vmem:[%s4202_s18] sm:$0xff] }
 0x3c2   :  { %v2115_v27 = vpop.f32.mrf.mxu3  ;;  %v2345_v23 = vld [vmem:[%s4200_s16] sm:$0xff]  ;;  %2399 = vmatpush.msrb.mxu3 %v2376_v22  ;;  %s2883_s16 = smov [#allocation3]  }
 0x3c3   :  { %v2118_v28 = vadd.f32 %v2115_v27, %v2088_v24  ;;  %v2205_v32 = vpop.f32.mrf.mxu2  ;;  %2371 = vmatpush.msra.mxu2 %v2345_v23  ;;  %v2817_v24 = vld [vmem:[%s4199_s15] ss:$0 sm:$0xff]  ;;  %s2418_s29 = sshll.u32 %s2883_s16, 4  ;;  %s2420_s15 = sshll.u32 %s4204_s20, 4  ;;  %s2419_s29 = int_to_ptr.vmem [resolvable:$true] %s2418_s29  ;;  %s2421_s15 = int_to_ptr.hbm [resolvable:$true] %s2420_s15 }
 0x3c4   :  { %v2145_v26 = vpop.f32.mrf.mxu0 }
 0x3c5   :  { %v2148_v41 = vadd.f32 %v2145_v26, %v2118_v28 }
 0x3c7   :  { %v2178_v30 = vadd.f32 %v2175_v12, %v2148_v41  ;;  %v2818_v41 = vld [vmem:[%s4201_s17] ss:$0 sm:$0xff]  ;;  %s2884_s17 = smov [#allocation5]  }
 0x3c8   :  { %v2819_v12 = vld [vmem:[%s4203_s19] ss:$0 sm:$0xff]  ;;  %s2429_s19 = sshll.u32 %s2884_s17, 4  ;;  %s2430_s19 = int_to_ptr.vmem [resolvable:$true] %s2429_s19 }
 0x3c9   :  { %v2208_v59 = vadd.f32 %v2205_v32, %v2178_v30 }
 0x3cb   :  { %v2213_v34 = vadd.f32 %v2813_v31, %v2208_v59 }
 0x3cd   :  { %v2214_v35 = vsel %vm1460_vm5, %v2213_v34, 0.0 }
 0x3ce   :  { %2215 = vadd.xlane.f32.xlu0 %v2214_v35 }
 0x418   :  { %v2281_v17 = vpop.f32.mrf.mxu3 }
 0x441   :  { %v2216_v45 = vpop.xlane.xlu0 %2215 }
 0x442   :  { %v2224_v46 = vmul.f32 %v2223_v57, %v2216_v45 }
 0x444   :  { %v2225_v50 = vsub.f32 %v2213_v34, %v2224_v46 }
 0x446   :  { %v2226_v37 = vmul.f32 %v2225_v50, %v2225_v50 }
 0x448   :  { %v2227_v33 = vsel %vm1460_vm5, %v2226_v37, 0.0 }
 0x449   :  { %2228 = vadd.xlane.f32.xlu0 %v2227_v33 }
 0x4bc   :  { %v2229_v60 = vpop.xlane.xlu0 %2228 }
 0x4bd   :  { %v2230_v62 = vmul.f32 %v2229_v60, %v2223_v57 }
 0x4bf   :  { %v2231_v63 = vadd.f32 1e-05, %v2230_v62 }
 0x4c1   :  { %2822 = vrsqrt.f32 %v2231_v63  ;;  %vm2238_vm9 = vweird.f32 %v2231_v63 }
 0x4c7   :  { %v2823_v40 = vpop.eup %2822 }
 0x4c8   :  { %v2233_v0 = vmul.f32 %v2823_v40, %v2231_v63  ;;  %vm2239_vm8 = vweird.f32 %v2823_v40 }
 0x4c9   :  { %vm2240_vm10 = vmor %vm2238_vm9, %vm2239_vm8 }
 0x4ca   :  { %v2234_v21 = vmul.f32 %v2823_v40, %v2233_v0 }
 0x4cc   :  { %v2235_v52 = vmul.f32 0.5, %v2234_v21 }
 0x4ce   :  { %v2236_v25 = vsub.f32 1.5, %v2235_v52 }
 0x4d0   :  { %v2237_v1 = vmul.f32 %v2823_v40, %v2236_v25 }
 0x4d2   :  { %v2241_v3 = vsel %vm2240_vm10, %v2823_v40, %v2237_v1 }
 0x4d3   :  { %v2242_v7 = vmul.f32 %v2241_v3, %v2225_v50 }
 0x4d5   :  { %v2247_v8 = vmul.f32 %v2814_v2, %v2242_v7 }
 0x4d7   :  { %v2252_v38 = vadd.f32 %v2815_v6, %v2247_v8 }
 0x4d9   :  { %2824 = vtanh.f32 %v2252_v38 }
 0x4df   :  { %v2825_v10 = vpop.eup %2824 }
 0x4e0   :  { %2804 = vmatmul.msk.f32.vlgmr.msra.gmra.mxu0 %vm351_vm4, %v2825_v10 }
 0x55d   :  { %v2304_v56 = vpop.f32.mrf.mxu0 }
 0x55e   :  { %v2305_v18 = vadd.f32 %v2304_v56, %v2281_v17 }
 0x560   :  { %v2311_v13 = vadd.f32 %v2816_v4, %v2305_v18 }
 0x562   :  { %v2312_v43 = vmax.f32 %v2311_v13, 0.0 }
 0x564   :  { %2805 = vmatmul.msk.f32.vlgmr.msra.gmra.mxu1 %vm351_vm4, %v2312_v43 }
 0x5e1   :  { %v2341_v27 = vpop.f32.mrf.mxu1 }
 0x5e2   :  { %v2342_v28 = vadd.f32 %v2817_v24, %v2341_v27 }
 0x5e4   :  { %v2344_v26 = vmax.f32 %v2342_v28, 0.0 }
 0x5e6   :  { %2806 = vmatmul.msk.f32.vlgmr.msra.gmra.mxu2 %vm351_vm4, %v2344_v26  ;;  %2807 = vmatmul.msk.f32.vlgmr.msrb.gmra.mxu3 %vm351_vm4, %v2344_v26 }
 0x669   :  { %v2373_v30 = vpop.f32.mrf.mxu2  ;;  %v2401_v31 = vpop.f32.mrf.mxu3 }
 0x66a   :  { %v2374_v32 = vadd.f32 %v2818_v41, %v2373_v30  ;;  %v2402_v59 = vadd.f32 %v2819_v12, %v2401_v31 }
 0x66c   :  { %2826 = vtanh.f32 %v2402_v59  ;;  %2409 = vst.msk [vmem:[#allocation3] sm:$0x3] %vm2408_vm11, %v2374_v32 }
 0x66d   :  { %2423 = dma.vmem_to_hbm [thread:$0]  %s2419_s29, 32, %s2421_s15, [#allocation4]  }
 0x672   :  { %v2827_v34 = vpop.eup %2826 }
 0x673   :  { %v2405_v35 = vadd.f32 1.0, %v2827_v34 }
 0x675   :  { %v2406_v36 = vmul.f32 6.0, %v2405_v35 }
 0x677   :  { %v2407_v29 = vadd.f32 -10.0, %v2406_v36 }
 0x679   :  { %v2410_v20 = vmul.f32 1.442695, %v2407_v29 }
 0x67b   :  { %2828 = vpow2.f32 %v2410_v20 }
 0x681   :  { %v2829_v47 = vpop.eup %2828 }
 0x682   :  { %2412 = vst.msk [vmem:[#allocation5] sm:$0x3] %vm2408_vm11, %v2829_v47 }
 0x683   :  { %2434 = dma.vmem_to_hbm [thread:$0]  %s2430_s19, 32, %s2432_s30, [#allocation6]  }
 0x684   :  { %2878 = dma.done.wait [#allocation4], 32  }
 0x685   :  { %2879 = vsyncadd [#allocation4], 4294967264 }
 0x686   :  { %2880 = dma.done.wait [#allocation6], 32  }
 0x687   :  { %2881 = vsyncadd [#allocation6], 4294967264 }
 0x688   :  { %2443 = vsyncpa [#allocation4], 1 }
 0x689   :  { %2444 = vsyncpa [#allocation6], 1 }

</bundles_post_ra>
